<compile_context>
chip_gen: v7x
topology: tpu7x:2x2x1
jax: 0.10.0
libtpu: 0.0.40
codegen_flags: <defaults>
</compile_context>

<pallas_src>
import functools

import jax
import jax.numpy as jnp
import numpy as np
from jax import lax
from jax.experimental import pallas as pl
from jax.experimental.pallas import tpu as pltpu


def _spodnet_kernel(theta_ref, w_ref, w1t_ref, b1_ref, w2t_ref, b2_ref,
                    out_ref, w_s, *, K):
    f32 = jnp.float32
    Bb, p, _ = out_ref.shape

    # Working copies: Theta lives in the output block, W in VMEM scratch.
    out_ref[...] = theta_ref[...]
    w_s[...] = w_ref[...]

    W1T = w1t_ref[...]          # (p, p) zero-padded W1.T
    b1 = b1_ref[...]            # (1, p) zero-padded bias
    W2T = w2t_ref[...]
    b2 = b2_ref[...]

    i_idx = lax.broadcasted_iota(jnp.int32, (p, p), 0)
    j_idx = lax.broadcasted_iota(jnp.int32, (p, p), 1)
    lane = lax.broadcasted_iota(jnp.int32, (1, p), 1)
    lane_rhs = lax.broadcasted_iota(jnp.int32, (Bb, p, 1), 1)

    def col_step(step, carry):
        col = step % p

        ev = (lane == col).astype(f32)            # (1, p) one-hot at `col`
        nv = 1.0 - ev
        ev_rhs = (lane_rhs == col).astype(f32)    # (Bb, p, 1) one-hot matvec RHS

        # Permutation original index <-> "column-deleted" index for this column.
        mprime_j = jnp.where(j_idx == col, p - 1,
                             jnp.where(j_idx > col, j_idx - 1, j_idx))
        mprime_i = jnp.where(i_idx == col, p - 1,
                             jnp.where(i_idx > col, i_idx - 1, i_idx))
        P = (i_idx == mprime_j).astype(f32)       # P[m'(j), j] = 1
        Pt = (j_idx == mprime_i).astype(f32)      # == P.T

        # ---- Theta reads -------------------------------------------------
        Theta_full = out_ref[...]                                   # (Bb, p, p)
        theta_row = out_ref[:, pl.ds(col, 1), :].reshape(Bb, p)     # Theta[:, col, :]
        # Theta[:, :, col] via a one-hot matvec on the MXU (avoids lane-dynamic slice).
        theta_colv = jnp.einsum('bij,bjk->bik', Theta_full, ev_rhs,
                                preferred_element_type=f32)[..., 0]
        theta_22 = jnp.sum(theta_colv * ev, axis=1, keepdims=True)  # (Bb, 1)
        theta_12 = theta_colv * nv                                  # zero at `col`

        # ---- col_learner: permute -> (Linear, ReLU) x2 -> un-permute -------
        x_perm = jnp.dot(theta_12, Pt, preferred_element_type=f32)
        h1 = jnp.maximum(jnp.dot(x_perm, W1T, preferred_element_type=f32) + b1, 0.0)
        y_perm = jnp.maximum(jnp.dot(h1, W2T, preferred_element_type=f32) + b2, 0.0)
        t12n = jnp.dot(y_perm, P, preferred_element_type=f32)       # zero at `col`

        # ---- W reads / Schur term ------------------------------------------
        W_full = w_s[...]
        w_colv = jnp.einsum('bij,bjk->bik', W_full, ev_rhs,
                            preferred_element_type=f32)[..., 0]     # W[:, :, col]
        w_22 = jnp.sum(w_colv * ev, axis=1, keepdims=True)          # assumed > 0 (SPD input)
        w_12 = w_colv * nv
        inv_w22 = pl.reciprocal(w_22, approx=False)

        t12n_rhs = t12n[:, :, None]
        wt = jnp.einsum('bij,bjk->bik', W_full, t12n_rhs,
                        preferred_element_type=f32)[..., 0]         # == W_11 @ t12n
        schur = jnp.sum(wt * t12n, axis=1, keepdims=True)
        t22n = theta_22 + schur

        # inv_Theta_11 @ t12n without materializing inv_Theta_11 (rank-1 algebra).
        s12 = jnp.sum(w_12 * t12n, axis=1, keepdims=True)
        iv = (wt - (inv_w22 * s12) * w_12) * nv
        quad = jnp.sum(iv * t12n, axis=1, keepdims=True)
        denom = t22n - quad                       # == 1 / w_22_next, reused directly
        w22n = pl.reciprocal(denom, approx=False)
        w12n = -w22n * iv

        # ---- write-backs ----------------------------------------------------
        colmask = (j_idx == col)[None]            # (1, p, p)

        # W: fused rank-1 updates, new column via one select + full store, then a
        # cheap dynamic-sublane row store.
        w12_c = w_12[:, :, None]
        w12n_c = w12n[:, :, None]
        W11n = (W_full
                - inv_w22[:, :, None] * (w12_c * w_12[:, None, :])
                + denom[:, :, None] * (w12n_c * w12n[:, None, :]))
        w_colnew = w12n + w22n * ev
        w_s[...] = jnp.where(colmask, w_colnew[:, :, None], W11n)
        w_s[:, pl.ds(col, 1), :] = w_colnew[:, None, :]

        # Theta: new column via select, new row via dynamic sublane store.
        t_colnew = t12n + t22n * ev
        t_rownew = theta_row + (t12n - theta_12) + (t22n - theta_22) * ev
        out_ref[...] = jnp.where(colmask, t_colnew[:, :, None], Theta_full)
        out_ref[:, pl.ds(col, 1), :] = t_rownew[:, None, :]
        return carry

    # Single fused loop over K passes x p columns (sweep is inherently sequential).
    lax.fori_loop(0, K * p, col_step, 0)


def _pick_block_b(B, p, budget_bytes=32 << 20):
    """Largest divisor of B whose VMEM footprint (double-buffered in/out + scratch) fits."""
    per_mat = p * p * 4
    bb = B
    while bb > 1 and 7 * bb * per_mat > budget_bytes:
        bb -= 1
        while B % bb:
            bb -= 1
    return bb


def spodnet_forward(Theta, W1, b1, W2, b2, K=1, block_b=None):
    Theta = Theta.astype(jnp.float32)
    B, p, _ = Theta.shape
    # TODO(synk): the initial W = inv(Theta) (batched LU inverse) stays in plain JAX;
    # the full K x p per-column sweep runs inside the Pallas kernel.
    W0 = jnp.linalg.inv(Theta).astype(jnp.float32)

    # Zero-pad learner weights to (p, p) (transposed) and biases to (1, p).
    W1T = jnp.zeros((p, p), jnp.float32).at[: p - 1, : p - 1].set(W1.T)
    W2T = jnp.zeros((p, p), jnp.float32).at[: p - 1, : p - 1].set(W2.T)
    b1p = jnp.zeros((1, p), jnp.float32).at[0, : p - 1].set(b1)
    b2p = jnp.zeros((1, p), jnp.float32).at[0, : p - 1].set(b2)

    if block_b is None:
        block_b = _pick_block_b(B, p)
    assert B % block_b == 0

    kernel = functools.partial(_spodnet_kernel, K=K)
    batch_spec = pl.BlockSpec((block_b, p, p), lambda b: (b, 0, 0))
    mat_spec = pl.BlockSpec((p, p), lambda b: (0, 0))
    vec_spec = pl.BlockSpec((1, p), lambda b: (0, 0))

    return pl.pallas_call(
        kernel,
        out_shape=jax.ShapeDtypeStruct((B, p, p), jnp.float32),
        grid_spec=pltpu.PrefetchScalarGridSpec(
            num_scalar_prefetch=0,
            grid=(B // block_b,),
            in_specs=[batch_spec, batch_spec, mat_spec, vec_spec, mat_spec, vec_spec],
            out_specs=batch_spec,
            scratch_shapes=[pltpu.VMEM((block_b, p, p), jnp.float32)],
        ),
        compiler_params=pltpu.CompilerParams(
            dimension_semantics=("parallel",),
            # Above the 16/32 MiB scoped defaults, below v7x's 64 MiB physical VMEM.
            vmem_limit_bytes=48 * 1024 * 1024,
        ),
        input_output_aliases={0: 0},
    )(Theta, W0, W1T, b1p, W2T, b2p)


def _spodnet_reference_np(Theta0, W1, b1, W2, b2, K=1):
    """Pure numpy float64 reference mirroring the PyTorch module exactly."""
    Theta = Theta0.astype(np.float64).copy()
    W1 = W1.astype(np.float64); b1 = b1.astype(np.float64)
    W2 = W2.astype(np.float64); b2 = b2.astype(np.float64)
    B, p, _ = Theta.shape
    W = np.linalg.inv(Theta)
    idx = np.arange(p)

    def learner(x):
        h = np.maximum(x @ W1.T + b1, 0.0)
        return np.maximum(h @ W2.T + b2, 0.0)

    for _ in range(K):
        for col in range(p):
            im = np.concatenate([idx[:col], idx[col + 1:]])
            theta_22 = Theta[:, col, col].copy()
            theta_12 = Theta[:, im, col].copy()
            W_11 = W[:, im[:, None], im[None, :]].copy()
            w_22 = W[:, col, col].copy()
            w_12 = W[:, im, col].copy()
            inv_T11 = W_11 - (1.0 / w_22)[:, None, None] * w_12[:, :, None] * w_12[:, None, :]
            t12n = learner(theta_12)
            schur = np.einsum('bi,bij,bj->b', t12n, W_11, t12n)
            t22n = theta_22 + schur
            # Theta update via Delta
            Theta[:, im, col] = theta_12 + (t12n - theta_12)
            Theta[:, col, im] = Theta[:, col, im] + (t12n - theta_12)
            Theta[:, col, col] = theta_22 + (t22n - theta_22)
            # W update
            quad = np.einsum('bi,bij,bj->b', t12n, inv_T11, t12n)
            w22n = 1.0 / (t22n - quad)
            w12n = -w22n[:, None] * np.einsum('bij,bj->bi', inv_T11, t12n)
            W[:, im[:, None], im[None, :]] = inv_T11 + (1.0 / w22n)[:, None, None] * \
                w12n[:, :, None] * w12n[:, None, :]
            W[:, im, col] = w12n
            W[:, col, im] = w12n
            W[:, col, col] = w22n
    return Theta


if __name__ == "__main__":
    B, p, K = 4, 22, 1          # module default p=22; small batch, one pass
    key = jax.random.PRNGKey(0)
    k_theta, k_w1, k_b1, k_w2, k_b2 = jax.random.split(key, 5)

    # Well-conditioned SPD Theta (matches the module's implicit assumption).
    A = jax.random.normal(k_theta, (B, p, p), dtype=jnp.float32)
    Theta = jnp.matmul(A, jnp.swapaxes(A, 1, 2)) / p + jnp.eye(p, dtype=jnp.float32)[None]

    # col_learner parameters: Linear(p-1, p-1) -> ReLU -> Linear(p-1, p-1) -> ReLU
    W1 = 0.3 * jax.random.normal(k_w1, (p - 1, p - 1), dtype=jnp.float32)
    b1 = 0.1 * jax.random.normal(k_b1, (p - 1,), dtype=jnp.float32)
    W2 = 0.3 * jax.random.normal(k_w2, (p - 1, p - 1), dtype=jnp.float32)
    b2 = 0.1 * jax.random.normal(k_b2, (p - 1,), dtype=jnp.float32)

    # Snapshot inputs to host before the call (Theta is aliased to the kernel output).
    Theta_np, W1_np, b1_np, W2_np, b2_np = (np.asarray(x) for x in (Theta, W1, b1, W2, b2))

    out = spodnet_forward(Theta, W1, b1, W2, b2, K=K, block_b=2)
    out = jax.block_until_ready(out)

    ref = _spodnet_reference_np(Theta_np, W1_np, b1_np, W2_np, b2_np, K=K)
    np.testing.assert_allclose(np.asarray(out), ref, rtol=2e-3, atol=2e-3)
    print("KERNEL_OK")
</pallas_src>

<mosaic_0001>
module attributes {stable_mosaic.version = 11 : i64} {
  func.func @_spodnet_kernel(%arg0: i32, %arg1: memref<2x22x22xf32, #tpu.memory_space<vmem>>, %arg2: memref<2x22x22xf32, #tpu.memory_space<vmem>>, %arg3: memref<22x22xf32, #tpu.memory_space<vmem>>, %arg4: memref<1x22xf32, #tpu.memory_space<vmem>>, %arg5: memref<22x22xf32, #tpu.memory_space<vmem>>, %arg6: memref<1x22xf32, #tpu.memory_space<vmem>>, %arg7: memref<2x22x22xf32, #tpu.memory_space<vmem>>, %arg8: memref<2x22x22xf32, #tpu.memory_space<vmem>>) attributes {dimension_semantics = [#tpu.dimension_semantics<parallel>], iteration_bounds = array<i64: 2>, scalar_prefetch = 0 : i64, scratch_operands = 1 : i64, tpu.core_type = #tpu.core_type<tc>, window_params = [{transform_indices = @transform_0, window_bounds = array<i64: 2, 22, 22>}, {transform_indices = @transform_1, window_bounds = array<i64: 2, 22, 22>}, {pipeline_mode = #tpu.pipeline_mode<synchronous>, transform_indices = @transform_2, window_bounds = array<i64: 22, 22>}, {pipeline_mode = #tpu.pipeline_mode<synchronous>, transform_indices = @transform_3, window_bounds = array<i64: 1, 22>}, {pipeline_mode = #tpu.pipeline_mode<synchronous>, transform_indices = @transform_4, window_bounds = array<i64: 22, 22>}, {pipeline_mode = #tpu.pipeline_mode<synchronous>, transform_indices = @transform_5, window_bounds = array<i64: 1, 22>}, {transform_indices = @transform_6, window_bounds = array<i64: 2, 22, 22>}]} {
    %c0 = arith.constant 0 : index
    %c0_0 = arith.constant 0 : index
    %c0_1 = arith.constant 0 : index
    %0 = vector.load %arg1[%c0, %c0_0, %c0_1] : memref<2x22x22xf32, #tpu.memory_space<vmem>>, vector<2x22x22xf32>
    %c0_2 = arith.constant 0 : index
    %c0_3 = arith.constant 0 : index
    %c0_4 = arith.constant 0 : index
    %1 = vector.load %arg7[%c0_2, %c0_3, %c0_4] : memref<2x22x22xf32, #tpu.memory_space<vmem>>, vector<2x22x22xf32>
    tpu.vector_store %arg7[%c0_2, %c0_3, %c0_4], %0 {strides = array<i32>} : memref<2x22x22xf32, #tpu.memory_space<vmem>>, vector<2x22x22xf32>,
    %c0_5 = arith.constant 0 : index
    %c0_6 = arith.constant 0 : index
    %c0_7 = arith.constant 0 : index
    %2 = vector.load %arg2[%c0_5, %c0_6, %c0_7] : memref<2x22x22xf32, #tpu.memory_space<vmem>>, vector<2x22x22xf32>
    %c0_8 = arith.constant 0 : index
    %c0_9 = arith.constant 0 : index
    %c0_10 = arith.constant 0 : index
    %3 = vector.load %arg8[%c0_8, %c0_9, %c0_10] : memref<2x22x22xf32, #tpu.memory_space<vmem>>, vector<2x22x22xf32>
    tpu.vector_store %arg8[%c0_8, %c0_9, %c0_10], %2 {strides = array<i32>} : memref<2x22x22xf32, #tpu.memory_space<vmem>>, vector<2x22x22xf32>,
    %c0_11 = arith.constant 0 : index
    %c0_12 = arith.constant 0 : index
    %4 = vector.load %arg3[%c0_11, %c0_12] : memref<22x22xf32, #tpu.memory_space<vmem>>, vector<22x22xf32>
    %c0_13 = arith.constant 0 : index
    %c0_14 = arith.constant 0 : index
    %5 = vector.load %arg4[%c0_13, %c0_14] : memref<1x22xf32, #tpu.memory_space<vmem>>, vector<1x22xf32>
    %c0_15 = arith.constant 0 : index
    %c0_16 = arith.constant 0 : index
    %6 = vector.load %arg5[%c0_15, %c0_16] : memref<22x22xf32, #tpu.memory_space<vmem>>, vector<22x22xf32>
    %c0_17 = arith.constant 0 : index
    %c0_18 = arith.constant 0 : index
    %7 = vector.load %arg6[%c0_17, %c0_18] : memref<1x22xf32, #tpu.memory_space<vmem>>, vector<1x22xf32>
    %8 = tpu.iota {dimensions = array<i32: 0>} : vector<22x22xi32>
    %9 = tpu.iota {dimensions = array<i32: 1>} : vector<22x22xi32>
    %10 = tpu.iota {dimensions = array<i32: 1>} : vector<1x22xi32>
    %11 = tpu.iota {dimensions = array<i32: 1>} : vector<2x22x1xi32>
    %c0_i32 = arith.constant 0 : i32
    %c22_i32 = arith.constant 22 : i32
    %12 = arith.addi %c0_i32, %c22_i32 : i32
    %c1_i32 = arith.constant 1 : i32
    scf.for %arg9 = %c0_i32 to %12 step %c1_i32  : i32 {
      %c22_i32_20 = arith.constant 22 : i32
      %c0_i32_21 = arith.constant 0 : i32
      %13 = arith.cmpi eq, %c22_i32_20, %c0_i32_21 : i32
      %c1_i32_22 = arith.constant 1 : i32
      %14 = arith.select %13, %c1_i32_22, %c22_i32_20 : i32
      %15 = arith.remsi %arg9, %14 : i32
      %c0_i32_23 = arith.constant 0 : i32
      %16 = arith.cmpi ne, %15, %c0_i32_23 : i32
      %c0_i32_24 = arith.constant 0 : i32
      %17 = arith.cmpi slt, %15, %c0_i32_24 : i32
      %c0_i32_25 = arith.constant 0 : i32
      %18 = arith.cmpi slt, %14, %c0_i32_25 : i32
      %19 = arith.xori %17, %18 : i1
      %20 = arith.andi %19, %16 : i1
      %21 = arith.addi %15, %14 : i32
      %22 = arith.select %20, %21, %15 : i32
      %23 = vector.broadcast %22 : i32 to vector<1x22xi32>
      %24 = arith.cmpi eq, %10, %23 : vector<1x22xi32>
      %25 = arith.extui %24 : vector<1x22xi1> to vector<1x22xi32>
      %26 = arith.sitofp %25 : vector<1x22xi32> to vector<1x22xf32>
      %cst = arith.constant 1.000000e+00 : f32
      %27 = vector.broadcast %cst : f32 to vector<1x22xf32>
      %28 = arith.subf %27, %26 : vector<1x22xf32>
      %29 = vector.broadcast %22 : i32 to vector<2x22x1xi32>
      %30 = arith.cmpi eq, %11, %29 : vector<2x22x1xi32>
      %31 = arith.extui %30 : vector<2x22x1xi1> to vector<2x22x1xi32>
      %32 = arith.sitofp %31 : vector<2x22x1xi32> to vector<2x22x1xf32>
      %33 = vector.broadcast %22 : i32 to vector<22x22xi32>
      %34 = arith.cmpi eq, %9, %33 : vector<22x22xi32>
      %35 = vector.broadcast %22 : i32 to vector<22x22xi32>
      %36 = arith.cmpi sgt, %9, %35 : vector<22x22xi32>
      %c1_i32_26 = arith.constant 1 : i32
      %37 = vector.broadcast %c1_i32_26 : i32 to vector<22x22xi32>
      %38 = arith.subi %9, %37 : vector<22x22xi32>
      %39 = arith.select %36, %38, %9 : vector<22x22xi1>, vector<22x22xi32>
      %c21_i32 = arith.constant 21 : i32
      %40 = vector.broadcast %c21_i32 : i32 to vector<22x22xi32>
      %41 = arith.select %34, %40, %39 : vector<22x22xi1>, vector<22x22xi32>
      %42 = vector.broadcast %22 : i32 to vector<22x22xi32>
      %43 = arith.cmpi eq, %8, %42 : vector<22x22xi32>
      %44 = vector.broadcast %22 : i32 to vector<22x22xi32>
      %45 = arith.cmpi sgt, %8, %44 : vector<22x22xi32>
      %c1_i32_27 = arith.constant 1 : i32
      %46 = vector.broadcast %c1_i32_27 : i32 to vector<22x22xi32>
      %47 = arith.subi %8, %46 : vector<22x22xi32>
      %48 = arith.select %45, %47, %8 : vector<22x22xi1>, vector<22x22xi32>
      %c21_i32_28 = arith.constant 21 : i32
      %49 = vector.broadcast %c21_i32_28 : i32 to vector<22x22xi32>
      %50 = arith.select %43, %49, %48 : vector<22x22xi1>, vector<22x22xi32>
      %51 = arith.cmpi eq, %8, %41 : vector<22x22xi32>
      %52 = arith.extui %51 : vector<22x22xi1> to vector<22x22xi32>
      %53 = arith.sitofp %52 : vector<22x22xi32> to vector<22x22xf32>
      %54 = arith.cmpi eq, %9, %50 : vector<22x22xi32>
      %55 = arith.extui %54 : vector<22x22xi1> to vector<22x22xi32>
      %56 = arith.sitofp %55 : vector<22x22xi32> to vector<22x22xf32>
      %c0_29 = arith.constant 0 : index
      %c0_30 = arith.constant 0 : index
      %c0_31 = arith.constant 0 : index
      %57 = vector.load %arg7[%c0_29, %c0_30, %c0_31] : memref<2x22x22xf32, #tpu.memory_space<vmem>>, vector<2x22x22xf32>
      %c0_32 = arith.constant 0 : index
      %58 = arith.index_cast %22 : i32 to index
      %c0_33 = arith.constant 0 : index
      %59 = vector.load %arg7[%c0_32, %58, %c0_33] : memref<2x22x22xf32, #tpu.memory_space<vmem>>, vector<2x1x22xf32>
      %60 = vector.shape_cast %59 : vector<2x1x22xf32> to vector<2x22xf32>
      "tpu.trace_start"() <{level = 10 : i32, message = "bij,bjk->bik"}> : () -> ()
      %cst_34 = arith.constant dense<0.000000e+00> : vector<2x22x1xf32>
      %61 = tpu.matmul %57, %32, %cst_34 {dimension_numbers = #tpu.dot_dimension_numbers<[2], [1], [1], [2], [0, 0, 0, 1, 1, 2], [0], [0]>} : vector<2x22x22xf32>, vector<2x22x1xf32>, vector<2x22x1xf32> -> vector<2x22x1xf32>
      "tpu.trace_stop"() : () -> ()
      %62 = vector.shape_cast %61 : vector<2x22x1xf32> to vector<2x22xf32>
      %63 = vector.broadcast %26 : vector<1x22xf32> to vector<2x22xf32>
      %64 = arith.mulf %62, %63 : vector<2x22xf32>
      %cst_35 = arith.constant dense<0.000000e+00> : vector<2xf32>
      %65 = vector.multi_reduction <add>, %64, %cst_35 [1] : vector<2x22xf32> to vector<2xf32>
      %66 = vector.shape_cast %65 : vector<2xf32> to vector<2x1xf32>
      %67 = vector.broadcast %28 : vector<1x22xf32> to vector<2x22xf32>
      %68 = arith.mulf %62, %67 : vector<2x22xf32>
      %cst_36 = arith.constant dense<0.000000e+00> : vector<2x22xf32>
      %69 = tpu.matmul %68, %56, %cst_36 {dimension_numbers = #tpu.dot_dimension_numbers<[1], [0], [0], [1], [0, 0, 1, 1], [], []>} : vector<2x22xf32>, vector<22x22xf32>, vector<2x22xf32> -> vector<2x22xf32>
      %cst_37 = arith.constant dense<0.000000e+00> : vector<2x22xf32>
      %70 = tpu.matmul %69, %4, %cst_37 {dimension_numbers = #tpu.dot_dimension_numbers<[1], [0], [0], [1], [0, 0, 1, 1], [], []>} : vector<2x22xf32>, vector<22x22xf32>, vector<2x22xf32> -> vector<2x22xf32>
      %71 = vector.broadcast %5 : vector<1x22xf32> to vector<2x22xf32>
      %72 = arith.addf %70, %71 : vector<2x22xf32>
      %cst_38 = arith.constant 0.000000e+00 : f32
      %73 = vector.broadcast %cst_38 : f32 to vector<2x22xf32>
      %74 = arith.maximumf %72, %73 : vector<2x22xf32>
      %cst_39 = arith.constant dense<0.000000e+00> : vector<2x22xf32>
      %75 = tpu.matmul %74, %6, %cst_39 {dimension_numbers = #tpu.dot_dimension_numbers<[1], [0], [0], [1], [0, 0, 1, 1], [], []>} : vector<2x22xf32>, vector<22x22xf32>, vector<2x22xf32> -> vector<2x22xf32>
      %76 = vector.broadcast %7 : vector<1x22xf32> to vector<2x22xf32>
      %77 = arith.addf %75, %76 : vector<2x22xf32>
      %cst_40 = arith.constant 0.000000e+00 : f32
      %78 = vector.broadcast %cst_40 : f32 to vector<2x22xf32>
      %79 = arith.maximumf %77, %78 : vector<2x22xf32>
      %cst_41 = arith.constant dense<0.000000e+00> : vector<2x22xf32>
      %80 = tpu.matmul %79, %53, %cst_41 {dimension_numbers = #tpu.dot_dimension_numbers<[1], [0], [0], [1], [0, 0, 1, 1], [], []>} : vector<2x22xf32>, vector<22x22xf32>, vector<2x22xf32> -> vector<2x22xf32>
      %c0_42 = arith.constant 0 : index
      %c0_43 = arith.constant 0 : index
      %c0_44 = arith.constant 0 : index
      %81 = vector.load %arg8[%c0_42, %c0_43, %c0_44] : memref<2x22x22xf32, #tpu.memory_space<vmem>>, vector<2x22x22xf32>
      "tpu.trace_start"() <{level = 10 : i32, message = "bij,bjk->bik"}> : () -> ()
      %cst_45 = arith.constant dense<0.000000e+00> : vector<2x22x1xf32>
      %82 = tpu.matmul %81, %32, %cst_45 {dimension_numbers = #tpu.dot_dimension_numbers<[2], [1], [1], [2], [0, 0, 0, 1, 1, 2], [0], [0]>} : vector<2x22x22xf32>, vector<2x22x1xf32>, vector<2x22x1xf32> -> vector<2x22x1xf32>
      "tpu.trace_stop"() : () -> ()
      %83 = vector.shape_cast %82 : vector<2x22x1xf32> to vector<2x22xf32>
      %84 = vector.broadcast %26 : vector<1x22xf32> to vector<2x22xf32>
      %85 = arith.mulf %83, %84 : vector<2x22xf32>
      %cst_46 = arith.constant dense<0.000000e+00> : vector<2xf32>
      %86 = vector.multi_reduction <add>, %85, %cst_46 [1] : vector<2x22xf32> to vector<2xf32>
      %87 = vector.shape_cast %86 : vector<2xf32> to vector<2x1xf32>
      %88 = vector.broadcast %28 : vector<1x22xf32> to vector<2x22xf32>
      %89 = arith.mulf %83, %88 : vector<2x22xf32>
      %90 = tpu.reciprocal %87 : vector<2x1xf32> -> vector<2x1xf32>
      %91 = vector.shape_cast %80 : vector<2x22xf32> to vector<2x22x1xf32>
      "tpu.trace_start"() <{level = 10 : i32, message = "bij,bjk->bik"}> : () -> ()
      %cst_47 = arith.constant dense<0.000000e+00> : vector<2x22x1xf32>
      %92 = tpu.matmul %81, %91, %cst_47 {dimension_numbers = #tpu.dot_dimension_numbers<[2], [1], [1], [2], [0, 0, 0, 1, 1, 2], [0], [0]>} : vector<2x22x22xf32>, vector<2x22x1xf32>, vector<2x22x1xf32> -> vector<2x22x1xf32>
      "tpu.trace_stop"() : () -> ()
      %93 = vector.shape_cast %92 : vector<2x22x1xf32> to vector<2x22xf32>
      %94 = arith.mulf %93, %80 : vector<2x22xf32>
      %cst_48 = arith.constant dense<0.000000e+00> : vector<2xf32>
      %95 = vector.multi_reduction <add>, %94, %cst_48 [1] : vector<2x22xf32> to vector<2xf32>
      %96 = vector.shape_cast %95 : vector<2xf32> to vector<2x1xf32>
      %97 = arith.addf %66, %96 : vector<2x1xf32>
      %98 = arith.mulf %89, %80 : vector<2x22xf32>
      %cst_49 = arith.constant dense<0.000000e+00> : vector<2xf32>
      %99 = vector.multi_reduction <add>, %98, %cst_49 [1] : vector<2x22xf32> to vector<2xf32>
      %100 = vector.shape_cast %99 : vector<2xf32> to vector<2x1xf32>
      %101 = arith.mulf %90, %100 : vector<2x1xf32>
      %102 = vector.broadcast %101 : vector<2x1xf32> to vector<2x22xf32>
      %103 = arith.mulf %102, %89 : vector<2x22xf32>
      %104 = arith.subf %93, %103 : vector<2x22xf32>
      %105 = vector.broadcast %28 : vector<1x22xf32> to vector<2x22xf32>
      %106 = arith.mulf %104, %105 : vector<2x22xf32>
      %107 = arith.mulf %106, %80 : vector<2x22xf32>
      %cst_50 = arith.constant dense<0.000000e+00> : vector<2xf32>
      %108 = vector.multi_reduction <add>, %107, %cst_50 [1] : vector<2x22xf32> to vector<2xf32>
      %109 = vector.shape_cast %108 : vector<2xf32> to vector<2x1xf32>
      %110 = arith.subf %97, %109 : vector<2x1xf32>
      %111 = tpu.reciprocal %110 : vector<2x1xf32> -> vector<2x1xf32>
      %cst_51 = arith.constant 0.000000e+00 : f32
      %112 = vector.broadcast %cst_51 : f32 to vector<2x1xf32>
      %113 = arith.subf %112, %111 : vector<2x1xf32>
      %114 = vector.broadcast %113 : vector<2x1xf32> to vector<2x22xf32>
      %115 = arith.mulf %114, %106 : vector<2x22xf32>
      %116 = vector.broadcast %22 : i32 to vector<22x22xi32>
      %117 = arith.cmpi eq, %9, %116 : vector<22x22xi32>
      %118 = vector.shape_cast %117 : vector<22x22xi1> to vector<1x22x22xi1>
      %119 = vector.shape_cast %89 : vector<2x22xf32> to vector<2x22x1xf32>
      %120 = vector.shape_cast %115 : vector<2x22xf32> to vector<2x22x1xf32>
      %121 = vector.shape_cast %90 : vector<2x1xf32> to vector<2x1x1xf32>
      %122 = vector.shape_cast %89 : vector<2x22xf32> to vector<2x1x22xf32>
      %123 = vector.broadcast %119 : vector<2x22x1xf32> to vector<2x22x22xf32>
      %124 = vector.broadcast %122 : vector<2x1x22xf32> to vector<2x22x22xf32>
      %125 = arith.mulf %123, %124 : vector<2x22x22xf32>
      %126 = vector.broadcast %121 : vector<2x1x1xf32> to vector<2x22x22xf32>
      %127 = arith.mulf %126, %125 : vector<2x22x22xf32>
      %128 = arith.subf %81, %127 : vector<2x22x22xf32>
      %129 = vector.shape_cast %110 : vector<2x1xf32> to vector<2x1x1xf32>
      %130 = vector.shape_cast %115 : vector<2x22xf32> to vector<2x1x22xf32>
      %131 = vector.broadcast %120 : vector<2x22x1xf32> to vector<2x22x22xf32>
      %132 = vector.broadcast %130 : vector<2x1x22xf32> to vector<2x22x22xf32>
      %133 = arith.mulf %131, %132 : vector<2x22x22xf32>
      %134 = vector.broadcast %129 : vector<2x1x1xf32> to vector<2x22x22xf32>
      %135 = arith.mulf %134, %133 : vector<2x22x22xf32>
      %136 = arith.addf %128, %135 : vector<2x22x22xf32>
      %137 = vector.broadcast %111 : vector<2x1xf32> to vector<2x22xf32>
      %138 = vector.broadcast %26 : vector<1x22xf32> to vector<2x22xf32>
      %139 = arith.mulf %137, %138 : vector<2x22xf32>
      %140 = arith.addf %115, %139 : vector<2x22xf32>
      %141 = vector.shape_cast %140 : vector<2x22xf32> to vector<2x22x1xf32>
      %142 = vector.shape_cast %118 : vector<1x22x22xi1> to vector<1x22x22xi1>
      %143 = vector.broadcast %142 : vector<1x22x22xi1> to vector<2x22x22xi1>
      %144 = vector.shape_cast %141 : vector<2x22x1xf32> to vector<2x22x1xf32>
      %145 = vector.broadcast %144 : vector<2x22x1xf32> to vector<2x22x22xf32>
      %146 = arith.select %143, %145, %136 : vector<2x22x22xi1>, vector<2x22x22xf32>
      %c0_52 = arith.constant 0 : index
      %c0_53 = arith.constant 0 : index
      %c0_54 = arith.constant 0 : index
      %147 = vector.load %arg8[%c0_52, %c0_53, %c0_54] : memref<2x22x22xf32, #tpu.memory_space<vmem>>, vector<2x22x22xf32>
      tpu.vector_store %arg8[%c0_52, %c0_53, %c0_54], %146 {strides = array<i32>} : memref<2x22x22xf32, #tpu.memory_space<vmem>>, vector<2x22x22xf32>,
      %148 = vector.shape_cast %140 : vector<2x22xf32> to vector<2x1x22xf32>
      %c0_55 = arith.constant 0 : index
      %149 = arith.index_cast %22 : i32 to index
      %c0_56 = arith.constant 0 : index
      %150 = vector.load %arg8[%c0_55, %149, %c0_56] : memref<2x22x22xf32, #tpu.memory_space<vmem>>, vector<2x1x22xf32>
      tpu.vector_store %arg8[%c0_55, %149, %c0_56], %148 {strides = array<i32>} : memref<2x22x22xf32, #tpu.memory_space<vmem>>, vector<2x1x22xf32>,
      %151 = vector.broadcast %97 : vector<2x1xf32> to vector<2x22xf32>
      %152 = vector.broadcast %26 : vector<1x22xf32> to vector<2x22xf32>
      %153 = arith.mulf %151, %152 : vector<2x22xf32>
      %154 = arith.addf %80, %153 : vector<2x22xf32>
      %155 = arith.subf %80, %68 : vector<2x22xf32>
      %156 = arith.addf %60, %155 : vector<2x22xf32>
      %157 = arith.subf %97, %66 : vector<2x1xf32>
      %158 = vector.broadcast %157 : vector<2x1xf32> to vector<2x22xf32>
      %159 = vector.broadcast %26 : vector<1x22xf32> to vector<2x22xf32>
      %160 = arith.mulf %158, %159 : vector<2x22xf32>
      %161 = arith.addf %156, %160 : vector<2x22xf32>
      %162 = vector.shape_cast %154 : vector<2x22xf32> to vector<2x22x1xf32>
      %163 = vector.shape_cast %118 : vector<1x22x22xi1> to vector<1x22x22xi1>
      %164 = vector.broadcast %163 : vector<1x22x22xi1> to vector<2x22x22xi1>
      %165 = vector.shape_cast %162 : vector<2x22x1xf32> to vector<2x22x1xf32>
      %166 = vector.broadcast %165 : vector<2x22x1xf32> to vector<2x22x22xf32>
      %167 = arith.select %164, %166, %57 : vector<2x22x22xi1>, vector<2x22x22xf32>
      %c0_57 = arith.constant 0 : index
      %c0_58 = arith.constant 0 : index
      %c0_59 = arith.constant 0 : index
      %168 = vector.load %arg7[%c0_57, %c0_58, %c0_59] : memref<2x22x22xf32, #tpu.memory_space<vmem>>, vector<2x22x22xf32>
      tpu.vector_store %arg7[%c0_57, %c0_58, %c0_59], %167 {strides = array<i32>} : memref<2x22x22xf32, #tpu.memory_space<vmem>>, vector<2x22x22xf32>,
      %169 = vector.shape_cast %161 : vector<2x22xf32> to vector<2x1x22xf32>
      %c0_60 = arith.constant 0 : index
      %170 = arith.index_cast %22 : i32 to index
      %c0_61 = arith.constant 0 : index
      %171 = vector.load %arg7[%c0_60, %170, %c0_61] : memref<2x22x22xf32, #tpu.memory_space<vmem>>, vector<2x1x22xf32>
      tpu.vector_store %arg7[%c0_60, %170, %c0_61], %169 {strides = array<i32>} : memref<2x22x22xf32, #tpu.memory_space<vmem>>, vector<2x1x22xf32>,
    }
    %c22_i32_19 = arith.constant 22 : i32
    return
  }
  func.func @transform_0(%arg0: i32) -> (i32, i32, i32) {
    %c0_i32 = arith.constant 0 : i32
    %c0_i32_0 = arith.constant 0 : i32
    %c0_i32_1 = arith.constant 0 : i32
    return %arg0, %c0_i32, %c0_i32_0 : i32, i32, i32
  }
  func.func @transform_1(%arg0: i32) -> (i32, i32, i32) {
    %c0_i32 = arith.constant 0 : i32
    %c0_i32_0 = arith.constant 0 : i32
    %c0_i32_1 = arith.constant 0 : i32
    return %arg0, %c0_i32, %c0_i32_0 : i32, i32, i32
  }
  func.func @transform_2(%arg0: i32) -> (i32, i32) {
    %c0_i32 = arith.constant 0 : i32
    %c0_i32_0 = arith.constant 0 : i32
    %c0_i32_1 = arith.constant 0 : i32
    return %c0_i32, %c0_i32_0 : i32, i32
  }
  func.func @transform_3(%arg0: i32) -> (i32, i32) {
    %c0_i32 = arith.constant 0 : i32
    %c0_i32_0 = arith.constant 0 : i32
    %c0_i32_1 = arith.constant 0 : i32
    return %c0_i32, %c0_i32_0 : i32, i32
  }
  func.func @transform_4(%arg0: i32) -> (i32, i32) {
    %c0_i32 = arith.constant 0 : i32
    %c0_i32_0 = arith.constant 0 : i32
    %c0_i32_1 = arith.constant 0 : i32
    return %c0_i32, %c0_i32_0 : i32, i32
  }
  func.func @transform_5(%arg0: i32) -> (i32, i32) {
    %c0_i32 = arith.constant 0 : i32
    %c0_i32_0 = arith.constant 0 : i32
    %c0_i32_1 = arith.constant 0 : i32
    return %c0_i32, %c0_i32_0 : i32, i32
  }
  func.func @transform_6(%arg0: i32) -> (i32, i32, i32) {
    %c0_i32 = arith.constant 0 : i32
    %c0_i32_0 = arith.constant 0 : i32
    %c0_i32_1 = arith.constant 0 : i32
    return %arg0, %c0_i32, %c0_i32_0 : i32, i32, i32
  }
}

</mosaic_0001>

<bundles_post_ra>
// kernel: tpu_custom_call.1
= control target key start
LH: loop header
LB: loop body
LE: loop exit
PB: predicated region body
PF: predicated region fallthrough
CT: control target
= control target key end

     0   :  { %s2636_s21 = smov 0   ;;  %s3373_s0 = inlined_call_operand.vmem [shape: f32[4,22,22], index: 0, kind: input, shape index: {}, may-alias: {0,6}]   ;;  %s3374_s1 = inlined_call_operand.vmem [shape: f32[4,22,22], index: 1, kind: input, shape index: {}]   ;;  %s3375_s2 = inlined_call_operand.vmem [shape: f32[22,22], index: 2, kind: input, shape index: {}]   ;;  %s3376_s3 = inlined_call_operand.vmem [shape: f32[1,22], index: 3, kind: input, shape index: {}]   ;;  %s3377_s4 = inlined_call_operand.vmem [shape: f32[22,22], index: 4, kind: input, shape index: {}]   ;;  %s3378_s5 = inlined_call_operand.vmem [shape: f32[1,22], index: 5, kind: input, shape index: {}]   ;;  %s3379_s6 = inlined_call_operand.vmem [shape: f32[4,22,22], index: 6, kind: output, shape index: {}, may-alias: {0,6}]  }
   0x1 LB: > { %s2260_s22 = sadd.s32 4294967295, %s2589_s21   ;;  %p2264_p0 = scmp.ge.s32.totalorder %s2589_s21, 1  ;;  %s2589_s21 = sphi %s2636_s21, %s16_s21  }
   0x2   : > { %p226_p1 = scmp.lt.s32.totalorder %s2589_s21, 3 }
   0x4   : > { %p227_p2 = pnand %p2264_p0, %p226_p1 }
   0x5   : > { %s2265_s23 = sshll.u32 (!%p227_p2), %s2260_s22, 1  ;;  %v2647_v0 = vld [vmem:[%s3375_s2] sm:$0xff] (!%p227_p2)  ;;  %v2652_v1 = vld [vmem:[%s3375_s2 + $0x8] sm:$0xff] (!%p227_p2)  ;;  %v319_v3 = vlaneseq (!%p227_p2)  ;;  %v2662_v4 = vld [vmem:[%s3375_s2 + $0x10] sm:$0x3f] (!%p227_p2)  ;;  %vm291_vm0 = vcmask (!%p227_p2), 179200  }
   0x6   : > { %230 = sbr.rel (%p227_p2) target bundleno = 2272 (0x8e0), region = 44  ;;  %3385 = vst [vmem:[#allocation3_spill] sm:$0xff] (!%p227_p2), %v2647_v0  ;;  %3386 = vst [vmem:[#allocation4_spill] sm:$0xff] (!%p227_p2), %v2652_v1  ;;  %v2657_v2 = vld [vmem:[%s3377_s4] sm:$0xff] (!%p227_p2)  ;;  %p265_p3 = scmp.lt.s32.totalorder (!%p227_p2), %s2265_s23, 3  ;;  %v2672_v6 = vld [vmem:[%s3377_s4 + $0x8] sm:$0xff] (!%p227_p2) }
   0x7   : > { %3387 = vst [vmem:[#allocation5_spill] sm:$0xff] (!%p227_p2), %v2657_v2  ;;  %3388 = vst [vmem:[#allocation6_spill] sm:$0xff] (!%p227_p2), %v2662_v4  ;;  %v2667_v5 = vld [vmem:[%s3376_s3] ss:$0 sm:$0xff] (!%p227_p2)  ;;  %v2677_v7 = vld [vmem:[%s3377_s4 + $0x10] sm:$0x3f] (!%p227_p2) }
   0x8   : > { %3389 = vst [vmem:[#allocation7_spill] sm:$0xff] (!%p227_p2), %v2667_v5  ;;  %3390 = vst [vmem:[#allocation8_spill] sm:$0xff] (!%p227_p2), %v2672_v6  ;;  %v2682_v8 = vld [vmem:[%s3378_s5] ss:$0 sm:$0xff] (!%p227_p2)  ;;  %v2684_v9 = vshrl.u32 (!%p227_p2), %v319_v3, 7  ;;  %v2686_v10 = vand.u32 (!%p227_p2), 127, %v319_v3 }
   0x9   : > { %3391 = vst [vmem:[#allocation9_spill] sm:$0xff] (!%p227_p2), %v2677_v7  ;;  %3392 = vst [vmem:[#allocation10_spill] sm:$0xff] (!%p227_p2), %v2682_v8  ;;  %vm294_vm1 = vcmask (!%p227_p2), 177152   ;;  %s2723_s27 = smov (!%p227_p2), 0  }
   0xa   : > { %3393 = vst [vmem:[#allocation11_spill] sm:$0xff] (!%p227_p2), %v2686_v10  ;;  %v2689_v11 = vadd.s32 (!%p227_p2), 8, %v2684_v9  ;;  %v2692_v12 = vadd.s32 (!%p227_p2), 16, %v2684_v9 }
   0xc   : > { %3394 = vst [vmem:[#allocation12_spill] sm:$0xff] (!%p227_p2), %v2689_v11  ;;  %3395 = vst [vmem:[#allocation13_spill] sm:$0xff] (!%p227_p2), %v2692_v12 }
   0xd   : > { %s3416_s23 = smov (!%p265_p3, %s2265_s23), 3 }
   0xe   : > { %s2544_s16 = smul.u32 24, %s3416_s23 }
  0x10   : > { %s269_s19 = scalar_lea.vmem %s3373_s0, %s2544_s16  ;;  %s2700_s24 = scalar_lea.vmem %s3379_s6, %s2544_s16 }
  0x11   : > { %v285_v13 = vld [vmem:[%s269_s19] sm:$0xff]  ;;  %v288_v14 = vld [vmem:[%s269_s19 + $0x18] sm:$0xff]  ;;  %v286_v15 = vld [vmem:[%s269_s19 + $0x8] sm:$0xff]  ;;  %s276_s26 = scalar_lea.vmem %s3374_s1, %s2544_s16 }
  0x12   : > { %292 = vst.msk [vmem:[%s2700_s24] sm:$0xff] %vm291_vm0, %v285_v13  ;;  %v299_v19 = vld [vmem:[%s276_s26] sm:$0xff]  ;;  %v300_v20 = vld [vmem:[%s276_s26 + $0x8] sm:$0xff]  ;;  %v301_v21 = vld [vmem:[%s276_s26 + $0x10] sm:$0x3f] }
  0x13   : > { %305 = vst.msk [vmem:[#allocation2] sm:$0xff] %vm291_vm0, %v299_v19  ;;  %306 = vst.msk [vmem:[#allocation2 + $0x8] sm:$0xff] %vm291_vm0, %v300_v20  ;;  %v302_v22 = vld [vmem:[%s276_s26 + $0x18] sm:$0xff]  ;;  %v303_v23 = vld [vmem:[%s276_s26 + $0x20] sm:$0xff] }
  0x14   : > { %307 = vst.msk [vmem:[#allocation2 + $0x10] sm:$0x3f] %vm294_vm1, %v301_v21  ;;  %v304_v24 = vld [vmem:[%s276_s26 + $0x28] sm:$0x3f] }
  0x15   : > { %308 = vst.msk [vmem:[#allocation2 + $0x18] sm:$0xff] %vm291_vm0, %v302_v22  ;;  %309 = vst.msk [vmem:[#allocation2 + $0x20] sm:$0xff] %vm291_vm0, %v303_v23 }
  0x16   : > { %310 = vst.msk [vmem:[#allocation2 + $0x28] sm:$0x3f] %vm294_vm1, %v304_v24 }
  0x19   : > { %v289_v16 = vld [vmem:[%s269_s19 + $0x20] sm:$0xff]  ;;  %v287_v17 = vld [vmem:[%s269_s19 + $0x10] sm:$0x3f]  ;;  %v290_v18 = vld [vmem:[%s269_s19 + $0x28] sm:$0x3f] }
  0x1a   : > { %296 = vst.msk [vmem:[%s2700_s24 + $0x18] sm:$0xff] %vm291_vm0, %v288_v14  ;;  %293 = vst.msk [vmem:[%s2700_s24 + $0x8] sm:$0xff] %vm291_vm0, %v286_v15 }
  0x1b   : > { %295 = vst.msk [vmem:[%s2700_s24 + $0x10] sm:$0x3f] %vm294_vm1, %v287_v17  ;;  %298 = vst.msk [vmem:[%s2700_s24 + $0x28] sm:$0x3f] %vm294_vm1, %v290_v18 }
  0x1c   : > { %297 = vst.msk [vmem:[%s2700_s24 + $0x20] sm:$0xff] %vm291_vm0, %v289_v16 }
  0x1d LB: >> { %v3396_v12 = vld [vmem:[#allocation13_spill] sm:$0xff]  ;;  %v3397_v11 = vld [vmem:[#allocation12_spill] sm:$0xff]  ;;  %v3398_v10 = vld [vmem:[#allocation11_spill] sm:$0xff]  ;;  %v2595_v25 = vmov 0.0|0.0   ;;  %s332_s28 = ssub.s32 0, %s2593_s27  ;;  %vm2596_vm2 = vmmov 0   ;;  %s2593_s27 = sphi %s2723_s27, %s330_s27  }
  0x1e   : >> { %2514 = vmatprep.subr.bf16.mxu0 %v2595_v25  ;;  %2517 = vmatprep.subr.bf16.mxu1 %v2595_v25  ;;  %v2597_v26 = vmov 0.0   ;;  %s2271_s29 = smin.u32 %s2593_s27, %s332_s28  ;;  %p331_p4 = scmp.lt.s32.totalorder %s2593_s27, 0  ;;  %v2279_v28 = vadd.s32 4294967295, %v2684_v9  ;;  %v2280_v29 = vadd.s32 4294967295, %v3397_v11  ;;  %v2598_v32 = vmov 1.0|1.0  }
  0x1f   : >> { %2394 = vmatprep.mubr.msk.f32.mxu0 %vm2596_vm2, %v2597_v26  ;;  %2409 = vmatprep.mubr.msk.f32.mxu1 %vm2596_vm2, %v2597_v26  ;;  %2570 = sdivrem.u32 %s2271_s29, 22  ;;  %v2281_v33 = vadd.s32 4294967295, %v3396_v12  ;;  %vm410_vm10 = vcmask 1045504   ;;  %v392_v37 = vld [vmem:[%s2700_s24] sm:$0xff]  ;;  %v2599_v50 = vmov 0   ;;  %v3405_v0 = vld [vmem:[#allocation3_spill] sm:$0xff] }
  0x20   : >> { %2568 = vset.pattern.permute.xlu1 %v2599_v50  ;;  %2569 = vset.pattern.permute.xlu0 %v2599_v50  ;;  %v3406_v1 = vld [vmem:[#allocation4_spill] sm:$0xff]  ;;  %v3407_v4 = vld [vmem:[#allocation6_spill] sm:$0xff]  ;;  %v632_v22 = vadd.s32 4294967288, %v3398_v10  ;;  %v639_v23 = vadd.s32 4294967280, %v3398_v10  ;;  %v3408_v2 = vld [vmem:[#allocation5_spill] sm:$0xff]  ;;  %s330_s27 = sadd.s32 1, %s2593_s27  }
  0x21   : >> { %v2790_v38 = vld [vmem:[%s2700_s24 + $0x18] sm:$0xff]  ;;  %v393_v44 = vld [vmem:[%s2700_s24 + $0x8] sm:$0xff]  ;;  %v2524_v20 = vpack.c.bf16 %v3406_v1, %v3405_v0  ;;  %v3410_v7 = vld [vmem:[#allocation9_spill] sm:$0xff]  ;;  %p327_p6 = scmp.ge.s32.totalorder %s330_s27, 22  }
  0x22   : >> { %v394_v47 = vld [vmem:[%s2700_s24 + $0x10] sm:$0x3f]  ;;  %v2837_v48 = vld [vmem:[%s2700_s24 + $0x28] sm:$0x3f]  ;;  %v3409_v6 = vld [vmem:[#allocation8_spill] sm:$0xff] }
  0x23   : >> { %v2819_v45 = vld [vmem:[%s2700_s24 + $0x20] sm:$0xff]  ;;  %3404 = vst [vmem:[#allocation15_spill] sm:$0xff] %v2837_v48  ;;  %v3411_v5 = vld [vmem:[#allocation7_spill] sm:$0xff]  ;;  %v3412_v8 = vld [vmem:[#allocation10_spill] sm:$0xff] }
  0x24   : >> { %3403 = vst [vmem:[#allocation14_spill] sm:$0xff] %v2819_v45  ;;  %v2991_v31 = vld [vmem:[#allocation2 + $0x20] sm:$0xff] }
  0x28   : >> { %s2571_s30 = spop.drf %2570 }
  0x29   : >> { %s336_s7 = ssub.s32 0, %s2571_s30 }
  0x2a   : >> { %s3418_s7 = smov (!%p331_p4, %s336_s7), %s2571_s30 }
  0x2b   : >> { %p2273_p5 = scmp.lt.s32.totalorder %s3418_s7, 0  ;;  %s342_s8 = sadd.s32 22, %s3418_s7 }
  0x2d   : >> { %s3420_s8 = smov (!%p2273_p5, %s342_s8), %s3418_s7 }
  0x2e   : >> { %v2740_v27 = vstv %s3420_s8  ;;  %s3246_s9 = scalar_lea.vmem %s2700_s24, %s3420_s8  ;;  %s2117_s10 = scalar_lea.vmem [#allocation2], %s3420_s8 }
  0x2f   : >> { %vm2746_vm3 = vcmp.eq.s32.totalorder %v3398_v10, %v2740_v27  ;;  %vm349_vm4 = vcmp.eq.s32.totalorder %v2684_v9, %v2740_v27  ;;  %vm350_vm5 = vcmp.eq.s32.totalorder %v3397_v11, %v2740_v27  ;;  %vm362_vm6 = vcmp.gt.s32.totalorder %v2684_v9, %v2740_v27 }
  0x30   : >> { %vm363_vm7 = vcmp.gt.s32.totalorder %v3397_v11, %v2740_v27  ;;  %vm2764_vm8 = vmpackc.low %vm350_vm5, %vm349_vm4  ;;  %vm351_vm9 = vcmp.eq.s32.totalorder %v3396_v12, %v2740_v27  ;;  %v368_v34 = vsel %vm362_vm6, %v2279_v28, %v2684_v9  ;;  %v2784_v36 = vsel %vm2746_vm3, 1.0, %v2597_v26 }
  0x31   : >> { %2516 = vmatpush3.bf16.msk.msra.mxu0 %vm2764_vm8, %v2598_v32  ;;  %2519 = vmatpush3.bf16.msk.msra.mxu1 %vm2764_vm8, %v2598_v32  ;;  %v369_v35 = vsel %vm363_vm7, %v2280_v29, %v3397_v11  ;;  %vm364_vm11 = vcmp.gt.s32.totalorder %v3396_v12, %v2740_v27  ;;  %v2796_v39 = vsel %vm351_vm9, 1.0, %v2597_v26  ;;  %v348_v40 = vsub.f32 1.0, %v2784_v36 }
  0x32   : >> { %2392 = vmatprep.subr.mxu0 %v2597_v26  ;;  %2407 = vmatprep.subr.mxu1 %v2597_v26  ;;  %v371_v41 = vsel %vm349_vm4, 21, %v368_v34  ;;  %v372_v42 = vsel %vm350_vm5, 21, %v369_v35  ;;  %v370_v43 = vsel %vm364_vm11, %v2281_v33, %v3396_v12  ;;  %v2892_v29 = vsub.s32 %v632_v22, %v2684_v9  ;;  %v2958_v22 = vld [vmem:[#allocation2 + $0x8] sm:$0xff] }
  0x33   : >> { %vm383_vm12 = vcmp.eq.s32.totalorder %v3398_v10, %v371_v41  ;;  %vm384_vm13 = vcmp.eq.s32.totalorder %v3398_v10, %v372_v42  ;;  %669 = vbcast.lane.b32.xlu0 %v348_v40, 256  ;;  %677 = vbcast.lane.b32.xlu1 %v348_v40, 272  ;;  %v373_v46 = vsel %vm351_vm9, 21, %v370_v43  ;;  %v2895_v33 = vsub.s32 %v639_v23, %v2684_v9  ;;  %v2964_v23 = vld [vmem:[#allocation2 + $0x10] sm:$0x3f] }
  0x34   : >> { %vm2521_vm14 = vmpackc.low %vm384_vm13, %vm383_vm12  ;;  %vm385_vm15 = vcmp.eq.s32.totalorder %v3398_v10, %v373_v46  ;;  %v2899_v34 = vsub.s32 %v3398_v10, %v2684_v9  ;;  %vm637_vm4 = vcmask 130112   ;;  %vm644_vm5 = vcmask 195712  }
  0x35   : >> { %2393 = vmatpush3.msk.msra.mxu0 %vm410_vm10, %v2796_v39  ;;  %2408 = vmatpush3.msk.msra.mxu1 %vm410_vm10, %v2796_v39  ;;  %v2287_v49 = vsel %vm385_vm15, 1.0, %v2597_v26  ;;  %vm660_vm6 = vcmask 1041409   ;;  %vm358_vm7 = vcmp.gt.s32.totalorder %v3398_v10, %v2740_v27 }
  0x36   : >> { %2395 = vmatmul.mubr.msk.f32.vlgmr.msra.gmra.mrb[0].mxu0 %vm291_vm0, %v392_v37  ;;  %2410 = vmatmul.mubr.msk.f32.vlgmr.msra.gmra.mrb[0].mxu1 %vm291_vm0, %v2790_v38 }
  0x37   : >> { %2397 = vmatprep.mubr.msk.f32.mxu0 %vm2596_vm2, %v2597_v26  ;;  %2412 = vmatprep.mubr.msk.f32.mxu1 %vm2596_vm2, %v2597_v26 }
  0x38   : >> { %2520 = vmatprep.subr.bf16.mxu0 %v2595_v25  ;;  %2523 = vmatprep.subr.bf16.mxu1 %v2595_v25 }
  0x39   : >> { %673 = vbcast.lane.b32.xlu0 %v348_v40, 264  ;;  %2522 = vmatpush3.bf16.msk.msra.mxu0 %vm2521_vm14, %v2598_v32 }
  0x3a   : >> { %2398 = vmatmul.mubr.msk.f32.gmra.mrb[2].mxu0 %vm291_vm0, %v393_v44  ;;  %2413 = vmatmul.mubr.msk.f32.gmra.mrb[2].mxu1 %vm291_vm0, %v2819_v45 }
  0x3b   : >> { %2400 = vmatprep.mubr.msk.f32.mxu0 %vm2596_vm2, %v2597_v26  ;;  %2415 = vmatprep.mubr.msk.f32.mxu1 %vm2596_vm2, %v2597_v26 }
  0x3c   : >> { %2422 = vmatprep.subr.mxu0 %v2597_v26  ;;  %2525 = vmatpush3.bf16.msra.mxu1 %v2524_v20 }
  0x3d   : >> { %2423 = vmatpush3.msk.msra.mxu0 %vm410_vm10, %v2287_v49  ;;  %2431 = vmatprep.subr.mxu1 %v2597_v26 }
  0x3e   : >> { %2401 = vmatmul.mubr.msk.f32.gmra.mrb[4].mxu0 %vm291_vm0, %v394_v47  ;;  %2416 = vmatmul.mubr.msk.f32.gmra.mrb[4].mxu1 %vm291_vm0, %v2837_v48 }
  0x3f   : >> { %2424 = vmatprep.mubr.msk.f32.mxu0 %vm2596_vm2, %v2597_v26  ;;  %2433 = vmatprep.mubr.msk.f32.mxu1 %vm2596_vm2, %v2597_v26 }
  0x40   : >> { %2526 = vmatprep.subr.bf16.mxu0 %v2595_v25  ;;  %2432 = vmatpush3.msk.msra.mxu1 %vm410_vm10, %v3407_v4 }
  0x41   : >> { %2529 = vmatprep.subr.bf16.mxu1 %v2595_v25 }
  0xa5   : >> { %v2852_v51 = vpop.permute.xlu0 %669  ;;  %v2870_v3 = vpop.permute.xlu1 %677 }
  0xab   : >> { %v2860_v57 = vpop.permute.xlu0 %673 }
 0x109   : >> { %v2854_v52 = vpop.f32.mrb[0].mxu0  ;;  %v2856_v53 = vpop.f32.mrb[0].mxu1 }
 0x10a   : >> { %v2396_v54 = vpop.f32.mrb[1].mxu0  ;;  %v682_v55 = vmul.f32 %v2852_v51, %v2854_v52  ;;  %v2411_v56 = vpop.f32.mrb[1].mxu1  ;;  %v685_v61 = vmul.f32 %v2852_v51, %v2856_v53 }
 0x10c   : >> { %695 = vperm.xlu1 %2568, %v682_v55  }
 0x10d   : >> { %v2862_v58 = vpop.f32.mrb[2].mxu0  ;;  %v2864_v59 = vpop.f32.mrb[2].mxu1 }
 0x10e   : >> { %v2399_v60 = vpop.f32.mrb[3].mxu0  ;;  %v683_v62 = vmul.f32 %v2860_v57, %v2862_v58  ;;  %v2414_v63 = vpop.f32.mrb[3].mxu1  ;;  %v686_v15 = vmul.f32 %v2860_v57, %v2864_v59 }
 0x10f   : >> { %v2527_v60 = vpack.c.bf16 %v3409_v6, %v3408_v2 }
 0x110   : >> { %704 = vperm.xlu1 %2568, %v685_v61   ;;  %698 = vperm.xlu0 %2569, %v683_v62   ;;  %v2278_v61 = vadd.s32 4294967295, %v3398_v10 }
 0x111   : >> { %v2872_v13 = vpop.f32.mrb[4].mxu0  ;;  %v2874_v14 = vpop.f32.mrb[4].mxu1 }
 0x112   : >> { %v684_v16 = vmul.f32 %v2870_v3, %v2872_v13  ;;  %v2402_v17 = vpop.f32.mrb[5].mxu0  ;;  %v2417_v18 = vpop.f32.mrb[5].mxu1  ;;  %v687_v19 = vmul.f32 %v2870_v3, %v2874_v14  ;;  %v360_v62 = vsel %vm358_vm7, %v2278_v61, %v3398_v10 }
 0x113   : >> { %v361_v63 = vsel %vm2746_vm3, 21, %v360_v62 }
 0x114   : >> { %707 = vperm.xlu1 %2568, %v686_v15   ;;  %701 = vperm.xlu0 %2569, %v684_v16   ;;  %vm374_vm9 = vcmp.eq.s32.totalorder %v2684_v9, %v361_v63  ;;  %vm375_vm11 = vcmp.eq.s32.totalorder %v3397_v11, %v361_v63  ;;  %vm376_vm13 = vcmp.eq.s32.totalorder %v3396_v12, %v361_v63 }
 0x115   : >> { %vm2530_vm12 = vmpackc.low %vm375_vm11, %vm374_vm9  ;;  %v2284_v27 = vsel %vm376_vm13, 1.0, %v2597_v26 }
 0x118   : >> { %710 = vperm.xlu1 %2568, %v687_v19   ;;  %585 = vbcast.lane.b32.xlu0 %v2784_v36, 256 }
 0x18b   : >> { %v696_v21 = vpop.permute.xlu1 %695 }
 0x18c   : >> { %v715_v43 = vrot.slane %v696_v21, %v2899_v34  ;;  %v2949_v21 = vld [vmem:[#allocation2] sm:$0xff] }
 0x18f   : >> { %v705_v24 = vpop.permute.xlu1 %704  ;;  %v699_v28 = vpop.permute.xlu0 %698 }
 0x190   : >> { %v719_v40 = vrot.slane %v699_v28, %v2892_v29  ;;  %v729_v44 = vrot.slane %v705_v24, %v2899_v34 }
 0x192   : >> { %v720_v49 = vsel %vm637_vm4, %v719_v40, %v715_v43 }
 0x193   : >> { %v708_v35 = vpop.permute.xlu1 %707  ;;  %v702_v37 = vpop.permute.xlu0 %701 }
 0x194   : >> { %v733_v41 = vrot.slane %v708_v35, %v2892_v29  ;;  %v724_v42 = vrot.slane %v702_v37, %v2895_v33 }
 0x196   : >> { %v734_v50 = vsel %vm637_vm4, %v733_v41, %v729_v44  ;;  %v725_v54 = vsel %vm644_vm5, %v724_v42, %v720_v49  ;;  %v2980_v42 = vld [vmem:[#allocation2 + $0x18] sm:$0xff] }
 0x197   : >> { %v711_v46 = vpop.permute.xlu1 %710 }
 0x198   : >> { %v738_v47 = vrot.slane %v711_v46, %v2895_v33 }
 0x19a   : >> { %v739_v55 = vsel %vm644_vm5, %v738_v47, %v734_v50  ;;  %v3013_v50 = vsub.s32 1, %v2684_v9 }
 0x19b   : >> { %v2912_v56 = vsel %vm660_vm6, %v739_v55, %v725_v54 }
 0x19c   : >> { %2425 = vmatmul.mubr.msk.f32.vlgmr.msra.gmra.mrb[6].mxu0 %vm291_vm0, %v2912_v56 }
 0x19d   : >> { %2442 = vmatprep.mubr.msk.f32.mxu0 %vm2596_vm2, %v2597_v26  ;;  %2528 = vmatpush3.bf16.msra.mxu0 %v2527_v60 }
 0x19e   : >> { %2440 = vmatprep.subr.mxu0 %v2597_v26 }
 0x1a1   : >> { %2441 = vmatpush3.msk.msra.mxu0 %vm410_vm10, %v3410_v7 }
 0x1a2   : >> { %2532 = vmatprep.subr.bf16.mxu0 %v2595_v25 }
 0x26f   : >> { %v812_v15 = vpop.f32.mrb[6].mxu0 }
 0x270   : >> { %v2426_v16 = vpop.f32.mrb[7].mxu0  ;;  %2434 = vmatmul.mubr.msk.f32.vlgmr.msra.gmra.mrb[6].mxu1 %vm291_vm0, %v812_v15 }
 0x271   : >> { %2531 = vmatpush3.bf16.msk.msra.mxu1 %vm2530_vm12, %v2598_v32  ;;  %2451 = vmatprep.mubr.msk.f32.mxu1 %vm2596_vm2, %v2597_v26 }
 0x272   : >> { %2449 = vmatprep.subr.mxu1 %v2597_v26 }
 0x275   : >> { %2450 = vmatpush3.msk.msra.mxu1 %vm410_vm10, %v2284_v27  ;;  %v3023_v27 = vpop.permute.xlu0 %585 }
 0x276   : >> { %2535 = vmatprep.subr.bf16.mxu1 %v2595_v25 }
 0x343   : >> { %v894_v17 = vpop.f32.mrb[6].mxu1 }
 0x344   : >> { %v895_v18 = vadd.f32 %v3411_v5, %v894_v17  ;;  %v2435_v19 = vpop.f32.mrb[7].mxu1 }
 0x346   : >> { %v898_v20 = vmax.f32 %v895_v18, 0.0 }
 0x348   : >> { %2443 = vmatmul.mubr.msk.f32.vlgmr.msra.gmra.mrb[8].mxu0 %vm291_vm0, %v898_v20 }
 0x349   : >> { %2534 = vmatpush3.bf16.msk.msra.mxu0 %vm2764_vm8, %v2598_v32  ;;  %2460 = vmatprep.mubr.msk.f32.mxu0 %vm2596_vm2, %v2597_v26 }
 0x34a   : >> { %2458 = vmatprep.subr.mxu0 %v2597_v26 }
 0x34d   : >> { %2459 = vmatpush3.msk.msra.mxu0 %vm410_vm10, %v2796_v39 }
 0x34e   : >> { %2461 = vmatmul.mubr.msk.f32.vlgmr.msra.gmra.mrb[10].mxu0 %vm291_vm0, %v2949_v21  ;;  %2538 = vmatprep.subr.bf16.mxu0 %v2595_v25 }
 0x34f   : >> { %2463 = vmatprep.mubr.msk.f32.mxu0 %vm2596_vm2, %v2597_v26 }
 0x352   : >> { %2464 = vmatmul.mubr.msk.f32.gmra.mrb[12].mxu0 %vm291_vm0, %v2958_v22 }
 0x353   : >> { %2466 = vmatprep.mubr.msk.f32.mxu0 %vm2596_vm2, %v2597_v26 }
 0x356   : >> { %2467 = vmatmul.mubr.msk.f32.gmra.mrb[14].mxu0 %vm291_vm0, %v2964_v23 }
 0x357   : >> { %2490 = vmatprep.mubr.msk.f32.mxu0 %vm2596_vm2, %v2597_v26 }
 0x41b   : >> { %v977_v24 = vpop.f32.mrb[8].mxu0 }
 0x41c   : >> { %v978_v28 = vadd.f32 %v3412_v8, %v977_v24  ;;  %v2444_v35 = vpop.f32.mrb[9].mxu0 }
 0x41e   : >> { %v981_v37 = vmax.f32 %v978_v28, 0.0 }
 0x420   : >> { %2452 = vmatmul.mubr.msk.f32.vlgmr.msra.gmra.mrb[8].mxu1 %vm291_vm0, %v981_v37 }
 0x421   : >> { %v2972_v40 = vpop.f32.mrb[10].mxu0  ;;  %2537 = vmatpush3.bf16.msk.msra.mxu1 %vm2764_vm8, %v2598_v32  ;;  %2475 = vmatprep.mubr.msk.f32.mxu1 %vm2596_vm2, %v2597_v26  ;;  %vm2118_vm8 = vcmask 172032  }
 0x422   : >> { %v2462_v41 = vpop.f32.mrb[11].mxu0  ;;  %2473 = vmatprep.subr.mxu1 %v2597_v26  ;;  %v1242_v17 = vmul.f32 %v2972_v40, %v3023_v27 }
 0x425   : >> { %v2982_v43 = vpop.f32.mrb[12].mxu0  ;;  %2474 = vmatpush3.msk.msra.mxu1 %vm410_vm10, %v2796_v39  ;;  %v2999_v39 = vld [vmem:[#allocation2 + $0x28] sm:$0x3f] }
 0x426   : >> { %2476 = vmatmul.mubr.msk.f32.vlgmr.msra.gmra.mrb[10].mxu1 %vm291_vm0, %v2980_v42  ;;  %v2465_v44 = vpop.f32.mrb[13].mxu0  ;;  %2541 = vmatprep.subr.bf16.mxu1 %v2595_v25  ;;  %v3006_v25 = vsub.s32 0, %v2684_v9 }
 0x427   : >> { %2478 = vmatprep.mubr.msk.f32.mxu1 %vm2596_vm2, %v2597_v26 }
 0x429   : >> { %v2993_v32 = vpop.f32.mrb[14].mxu0 }
 0x42a   : >> { %2479 = vmatmul.mubr.msk.f32.gmra.mrb[12].mxu1 %vm291_vm0, %v2991_v31  ;;  %v2468_v46 = vpop.f32.mrb[15].mxu0 }
 0x42b   : >> { %2481 = vmatprep.mubr.msk.f32.mxu1 %vm2596_vm2, %v2597_v26 }
 0x42e   : >> { %2482 = vmatmul.mubr.msk.f32.gmra.mrb[14].mxu1 %vm291_vm0, %v2999_v39 }
 0x42f   : >> { %2505 = vmatprep.mubr.msk.f32.mxu1 %vm2596_vm2, %v2597_v26 }
 0x4f3   : >> { %v3008_v47 = vpop.f32.mrb[8].mxu1 }
 0x4f4   : >> { %v1315_v49 = vrot.slane %v3008_v47, %v3006_v25  ;;  %v2453_v54 = vpop.f32.mrb[9].mxu1  ;;  %v1330_v55 = vrot.slane %v3008_v47, %v3013_v50 }
 0x4f6   : >> { %1321 = vbcast.lane.b32.xlu1 %v1315_v49, 264  ;;  %1317 = vbcast.lane.b32.xlu0 %v1315_v49, 256 }
 0x4f9   : >> { %v1228_v60 = vpop.f32.mrb[10].mxu1 }
 0x4fa   : >> { %1336 = vbcast.lane.b32.xlu1 %v1330_v55, 264  ;;  %1332 = vbcast.lane.b32.xlu0 %v1330_v55, 256  ;;  %v2477_v61 = vpop.f32.mrb[11].mxu1 }
 0x4fd   : >> { %v3017_v62 = vpop.f32.mrb[12].mxu1 }
 0x4fe   : >> { %589 = vbcast.lane.b32.xlu1 %v2784_v36, 264  ;;  %593 = vbcast.lane.b32.xlu0 %v2784_v36, 272  ;;  %v2480_v63 = vpop.f32.mrb[13].mxu1 }
 0x501   : >> { %v3021_v15 = vpop.f32.mrb[14].mxu1 }
 0x502   : >> { %1340 = vbcast.lane.b32.xlu1 %v1330_v55, 272  ;;  %1325 = vbcast.lane.b32.xlu0 %v1315_v49, 272  ;;  %v2483_v16 = vpop.f32.mrb[15].mxu1 }
 0x506   : >> { %1514 = vbcast.lane.b32.xlu1 %v1315_v49, 256  ;;  %1518 = vbcast.lane.b32.xlu0 %v1315_v49, 264 }
 0x50a   : >> { %1529 = vbcast.lane.b32.xlu1 %v1330_v55, 256  ;;  %1533 = vbcast.lane.b32.xlu0 %v1330_v55, 264 }
 0x50e   : >> { %1522 = vbcast.lane.b32.xlu1 %v1315_v49, 272  ;;  %1537 = vbcast.lane.b32.xlu0 %v1330_v55, 272 }
 0x512   : >> { %1255 = vperm.xlu1 %2568, %v1242_v17   ;;  %v1245_v17 = vmul.f32 %v1228_v60, %v3023_v27 }
 0x568   : >> { %v1322_v18 = vpop.permute.xlu1 %1321  ;;  %v1318_v19 = vpop.permute.xlu0 %1317 }
 0x569   : >> { %v2539_v20 = vpack.c.bf16 %v1322_v18, %v1318_v19 }
 0x56b   : >> { %2540 = vmatpush3.bf16.msra.mxu0 %v2539_v20  ;;  %v1308_v20 = vmul.f32 %v1228_v60, %v2852_v51  ;;  %v1309_v60 = vmul.f32 %v3017_v62, %v2860_v57 }
 0x56c   : >> { %v1337_v24 = vpop.permute.xlu1 %1336  ;;  %v1333_v28 = vpop.permute.xlu0 %1332  ;;  %2488 = vmatprep.subr.mxu0 %v2597_v26 }
 0x56d   : >> { %v2542_v35 = vpack.c.bf16 %v1337_v24, %v1333_v28 }
 0x56f   : >> { %2543 = vmatpush3.bf16.msra.mxu1 %v2542_v35 }
 0x570   : >> { %v590_v37 = vpop.permute.xlu1 %589  ;;  %v594_v41 = vpop.permute.xlu0 %593  ;;  %2503 = vmatprep.subr.mxu1 %v2597_v26 }
 0x571   : >> { %v1243_v44 = vmul.f32 %v2982_v43, %v590_v37  ;;  %v1244_v46 = vmul.f32 %v2993_v32, %v594_v41  ;;  %v3032_v49 = vmul.f32 %v590_v37, %v2862_v58  ;;  %v3035_v54 = vmul.f32 %v594_v41, %v2872_v13 }
 0x572   : >> { %v3038_v55 = vmul.f32 %v590_v37, %v2864_v59  ;;  %v3041_v61 = vmul.f32 %v594_v41, %v2874_v14  ;;  %v1246_v58 = vmul.f32 %v3017_v62, %v590_v37  ;;  %v1305_v59 = vmul.f32 %v2972_v40, %v2852_v51 }
 0x573   : >> { %1258 = vperm.xlu0 %2569, %v1243_v44   ;;  %1261 = vperm.xlu1 %2568, %v1244_v46   ;;  %v1247_v19 = vmul.f32 %v3021_v15, %v594_v41  ;;  %v1306_v40 = vmul.f32 %v2982_v43, %v2860_v57  ;;  %v1307_v43 = vmul.f32 %v2993_v32, %v2870_v3 }
 0x574   : >> { %v1341_v63 = vpop.permute.xlu1 %1340  ;;  %v1326_v16 = vpop.permute.xlu0 %1325 }
 0x575   : >> { %2489 = vmatpush3.msk.msra.mxu0 %vm410_vm10, %v1326_v16  ;;  %2504 = vmatpush3.msk.msra.mxu1 %vm410_vm10, %v1341_v63  ;;  %v1310_v63 = vmul.f32 %v3021_v15, %v2870_v3 }
 0x576   : >> { %2491 = vmatmul.mubr.msk.f32.vlgmr.msra.gmra.mrb[16].mxu0 %vm291_vm0, %v2949_v21  ;;  %2506 = vmatmul.mubr.msk.f32.vlgmr.msra.gmra.mrb[16].mxu1 %vm291_vm0, %v2980_v42 }
 0x577   : >> { %1267 = vperm.xlu0 %2569, %v1246_v58   ;;  %1264 = vperm.xlu1 %2568, %v1245_v17  }
 0x578   : >> { %v3053_v13 = vpop.permute.xlu1 %1514  ;;  %v3055_v14 = vpop.permute.xlu0 %1518  ;;  %2493 = vmatprep.mubr.msk.f32.mxu0 %vm2596_vm2, %v2597_v26  ;;  %2508 = vmatprep.mubr.msk.f32.mxu1 %vm2596_vm2, %v2597_v26 }
 0x579   : >> { %v1609_v18 = vmul.f32 %v3053_v13, %v1305_v59  ;;  %v1610_v35 = vmul.f32 %v3055_v14, %v1306_v40 }
 0x57a   : >> { %2494 = vmatmul.mubr.msk.f32.gmra.mrb[18].mxu0 %vm291_vm0, %v2958_v22  ;;  %2509 = vmatmul.mubr.msk.f32.gmra.mrb[18].mxu1 %vm291_vm0, %v2991_v31 }
 0x57b   : >> { %1270 = vperm.xlu0 %2569, %v1247_v19   ;;  %1622 = vperm.xlu1 %2568, %v1609_v18  }
 0x57c   : >> { %v3070_v24 = vpop.permute.xlu1 %1529  ;;  %v3072_v28 = vpop.permute.xlu0 %1533  ;;  %2496 = vmatprep.mubr.msk.f32.mxu0 %vm2596_vm2, %v2597_v26  ;;  %2511 = vmatprep.mubr.msk.f32.mxu1 %vm2596_vm2, %v2597_v26  ;;  %vm663_vm2 = vcmask 173056  }
 0x57d   : >> { %v1612_v37 = vmul.f32 %v3070_v24, %v1308_v20  ;;  %v1613_v26 = vmul.f32 %v3072_v28, %v1309_v60 }
 0x57e   : >> { %2497 = vmatmul.mubr.msk.f32.gmra.mrb[20].mxu0 %vm291_vm0, %v2964_v23  ;;  %2512 = vmatmul.mubr.msk.f32.gmra.mrb[20].mxu1 %vm291_vm0, %v2999_v39 }
 0x57f   : >> { %1631 = vperm.xlu1 %2568, %v1612_v37   ;;  %1625 = vperm.xlu0 %2569, %v1610_v35  }
 0x580   : >> { %v3088_v41 = vpop.permute.xlu1 %1522  ;;  %v3092_v46 = vpop.permute.xlu0 %1537 }
 0x581   : >> { %v1611_v44 = vmul.f32 %v3088_v41, %v1307_v43  ;;  %v1614_v32 = vmul.f32 %v3092_v46, %v1310_v63 }
 0x583   : >> { %1628 = vperm.xlu1 %2568, %v1611_v44   ;;  %1634 = vperm.xlu0 %2569, %v1613_v26  }
 0x587   : >> { %1683 = vperm.xlu1 %2568, %v1306_v40   ;;  %1637 = vperm.xlu0 %2569, %v1614_v32  }
 0x58b   : >> { %1689 = vperm.xlu1 %2568, %v1308_v20   ;;  %1680 = vperm.xlu0 %2569, %v1305_v59  }
 0x58f   : >> { %1692 = vperm.xlu0 %2569, %v1309_v60  }
 0x591   : >> { %v1256_v62 = vpop.permute.xlu1 %1255 }
 0x592   : >> { %v1275_v35 = vrot.slane %v1256_v62, %v2899_v34 }
 0x5f2   : >> { %v1262_v16 = vpop.permute.xlu1 %1261  ;;  %v1259_v17 = vpop.permute.xlu0 %1258 }
 0x5f3   : >> { %v1279_v58 = vrot.slane %v1259_v17, %v2892_v29  ;;  %v1284_v26 = vrot.slane %v1262_v16, %v2895_v33 }
 0x5f5   : >> { %v1280_v40 = vsel %vm637_vm4, %v1279_v58, %v1275_v35 }
 0x5f6   : >> { %v1265_v18 = vpop.permute.xlu1 %1264  ;;  %v1268_v19 = vpop.permute.xlu0 %1267  ;;  %v1285_v32 = vsel %vm644_vm5, %v1284_v26, %v1280_v40 }
 0x5f7   : >> { %v1289_v15 = vrot.slane %v1265_v18, %v2899_v34  ;;  %v1293_v37 = vrot.slane %v1268_v19, %v2892_v29 }
 0x5f9   : >> { %v1294_v44 = vsel %vm637_vm4, %v1293_v37, %v1289_v15 }
 0x5fa   : >> { %v1623_v20 = vpop.permute.xlu1 %1622  ;;  %v1271_v59 = vpop.permute.xlu0 %1270 }
 0x5fb   : >> { %v1298_v60 = vrot.slane %v1271_v59, %v2895_v33  ;;  %v1642_v37 = vrot.slane %v1623_v20, %v2899_v34 }
 0x5fd   : >> { %v1299_v17 = vsel %vm644_vm5, %v1298_v60, %v1294_v44 }
 0x5fe   : >> { %v1632_v62 = vpop.permute.xlu1 %1631  ;;  %v1626_v0 = vpop.permute.xlu0 %1625  ;;  %v1300_v18 = vsel %vm660_vm6, %v1299_v17, %v1285_v32 }
 0x5ff   : >> { %v1302_v19 = vsel %vm663_vm2, %v1300_v18, 0.0  ;;  %v1646_v35 = vrot.slane %v1626_v0, %v2892_v29  ;;  %v1656_v26 = vrot.slane %v1632_v62, %v2899_v34 }
 0x600   : >> { %1303 = vadd.xlane.f32.xlu1 %v1302_v19 }
 0x601   : >> { %v1647_v44 = vsel %vm637_vm4, %v1646_v35, %v1642_v37 }
 0x602   : >> { %v1629_v16 = vpop.permute.xlu1 %1628  ;;  %v1635_v58 = vpop.permute.xlu0 %1634 }
 0x603   : >> { %v1660_v59 = vrot.slane %v1635_v58, %v2892_v29  ;;  %v1651_v15 = vrot.slane %v1629_v16, %v2895_v33 }
 0x605   : >> { %v1661_v32 = vsel %vm637_vm4, %v1660_v59, %v1656_v26  ;;  %v1652_v17 = vsel %vm644_vm5, %v1651_v15, %v1647_v44 }
 0x606   : >> { %v1638_v40 = vpop.permute.xlu0 %1637 }
 0x607   : >> { %v1665_v60 = vrot.slane %v1638_v40, %v2895_v33 }
 0x609   : >> { %v1666_v18 = vsel %vm644_vm5, %v1665_v60, %v1661_v32 }
 0x60a   : >> { %v1667_v0 = vsel %vm660_vm6, %v1666_v18, %v1652_v17  ;;  %v1681_v17 = vpop.permute.xlu0 %1680 }
 0x60b   : >> { %v1669_v19 = vsel %vm663_vm2, %v1667_v0, 0.0  ;;  %v1700_v18 = vrot.slane %v1681_v17, %v2899_v34 }
 0x60c   : >> { %1670 = vadd.xlane.f32.xlu0 %v1669_v19 }
 0x60e   : >> { %v1693_v1 = vpop.permute.xlu0 %1692 }
 0x60f   : >> { %v1718_v8 = vrot.slane %v1693_v1, %v2892_v29 }
 0x611   : >> { %1686 = vperm.xlu1 %2568, %v1307_v43   ;;  %v1684_v43 = vpop.permute.xlu1 %1683 }
 0x622   : >> { %1695 = vperm.xlu0 %2569, %v1310_v63   ;;  %v1690_v63 = vpop.permute.xlu1 %1689 }
 0x649   : >> { %v3121_v20 = vpop.f32.mrb[16].mxu0  ;;  %v3123_v62 = vpop.f32.mrb[16].mxu1 }
 0x64a   : >> { %v2492_v16 = vpop.f32.mrb[17].mxu0  ;;  %v2507_v58 = vpop.f32.mrb[17].mxu1 }
 0x64b   : >> { %v1704_v16 = vrot.slane %v1684_v43, %v2892_v29 }
 0x64d   : >> { %v3125_v35 = vpop.f32.mrb[18].mxu0  ;;  %v3127_v59 = vpop.f32.mrb[18].mxu1  ;;  %v1705_v58 = vsel %vm637_vm4, %v1704_v16, %v1700_v18  ;;  %v1714_v18 = vrot.slane %v1690_v63, %v2899_v34 }
 0x64e   : >> { %v2495_v15 = vpop.f32.mrb[19].mxu0  ;;  %v2510_v37 = vpop.f32.mrb[19].mxu1 }
 0x651   : >> { %v3129_v26 = vpop.f32.mrb[20].mxu0  ;;  %v3131_v40 = vpop.f32.mrb[20].mxu1 }
 0x652   : >> { %v2498_v60 = vpop.f32.mrb[21].mxu0  ;;  %v2513_v44 = vpop.f32.mrb[21].mxu1 }
 0x68d   : >> { %v1304_v32 = vpop.xlane.xlu1 %1303 }
 0x68e   : >> { %2572 = vrcp.f32 %v1304_v32 }
 0x691   : >> { %v1687_v0 = vpop.permute.xlu1 %1686 }
 0x692   : >> { %v1709_v19 = vrot.slane %v1687_v0, %v2895_v33 }
 0x694   : >> { %v1710_v15 = vsel %vm644_vm5, %v1709_v19, %v1705_v58  ;;  %v1719_v58 = vsel %vm637_vm4, %v1718_v8, %v1714_v18  ;;  %v601_v8 = vmul.f32 %v3023_v27, %v2856_v53  ;;  %v1549_v53 = vmul.f32 %v3072_v28, %v3127_v59 }
 0x695   : >> { %v1967_v44 = vmul.f32 %v1710_v15, %v1681_v17  ;;  %v1968_v2 = vmul.f32 %v1710_v15, %v1684_v43  ;;  %v1969_v4 = vmul.f32 %v1710_v15, %v1687_v0 }
 0x698   : >> { %v2573_v37 = vpop.eup %2572 }
 0x699   : >> { %v1932_v60 = vrot.slane %v2573_v37, %v3006_v25  ;;  %v1671_v7 = vpop.xlane.xlu0 %1670  ;;  %v1936_v43 = vrot.slane %v2573_v37, %v3013_v50 }
 0x69a   : >> { %v1672_v10 = vmul.f32 %v2573_v37, %v1671_v7 }
 0x69b   : >> { %v3139_v5 = vmul.f32 %v1969_v4, %v1932_v60  ;;  %v3141_v32 = vmul.f32 %v1967_v44, %v1932_v60  ;;  %v3143_v6 = vmul.f32 %v1968_v2, %v1932_v60 }
 0x6a1   : >> { %v1696_v16 = vpop.permute.xlu0 %1695 }
 0x6a2   : >> { %v1723_v19 = vrot.slane %v1696_v16, %v2895_v33 }
 0x6a4   : >> { %v1724_v4 = vsel %vm644_vm5, %v1723_v19, %v1719_v58 }
 0x6a5   : >> { %v1970_v17 = vmul.f32 %v1724_v4, %v1690_v63  ;;  %v1971_v0 = vmul.f32 %v1724_v4, %v1693_v1  ;;  %v1972_v44 = vmul.f32 %v1724_v4, %v1696_v16  ;;  %v1725_v2 = vsel %vm660_vm6, %v1724_v4, %v1710_v15 }
 0x6a6   : >> { %v1727_v60 = vmul.f32 %v1725_v2, %v1672_v10  ;;  %v598_v1 = vmul.f32 %v3023_v27, %v2854_v52  ;;  %v1545_v10 = vmul.f32 %v3053_v13, %v3121_v20  ;;  %v1546_v52 = vmul.f32 %v3055_v14, %v3125_v35 }
 0x6a7   : >> { %v3152_v11 = vmul.f32 %v1972_v44, %v1936_v43  ;;  %v3154_v12 = vmul.f32 %v1970_v17, %v1936_v43  ;;  %v3156_v48 = vmul.f32 %v1971_v0, %v1936_v43  ;;  %v1547_v27 = vmul.f32 %v3088_v41, %v3129_v26 }
 0x6a8   : >> { %v1732_v45 = vrot.slane %v1727_v60, %v3006_v25  ;;  %v1747_v7 = vrot.slane %v1727_v60, %v3013_v50 }
 0x6aa   : >> { %1738 = vbcast.lane.b32.xlu0 %v1732_v45, 264  ;;  %1734 = vbcast.lane.b32.xlu1 %v1732_v45, 256 }
 0x6ae   : >> { %1753 = vbcast.lane.b32.xlu0 %v1747_v7, 264  ;;  %1749 = vbcast.lane.b32.xlu1 %v1747_v7, 256 }
 0x6b2   : >> { %1757 = vbcast.lane.b32.xlu0 %v1747_v7, 272  ;;  %1742 = vbcast.lane.b32.xlu1 %v1732_v45, 272  ;;  %v1548_v45 = vmul.f32 %v3070_v24, %v3123_v62 }
 0x6b6   : >> { %614 = vperm.xlu0 %2569, %v3032_v49   ;;  %611 = vperm.xlu1 %2568, %v598_v1   ;;  %v1550_v49 = vmul.f32 %v3092_v46, %v3131_v40 }
 0x6ba   : >> { %620 = vperm.xlu0 %2569, %v601_v8   ;;  %617 = vperm.xlu1 %2568, %v3035_v54  }
 0x6be   : >> { %1558 = vperm.xlu0 %2569, %v1545_v10   ;;  %623 = vperm.xlu1 %2568, %v3038_v55  }
 0x6c2   : >> { %1567 = vperm.xlu0 %2569, %v1548_v45   ;;  %1561 = vperm.xlu1 %2568, %v1546_v52  }
 0x6c6   : >> { %626 = vperm.xlu0 %2569, %v3041_v61   ;;  %1570 = vperm.xlu1 %2568, %v1549_v53  }
 0x6ca   : >> { %1573 = vperm.xlu0 %2569, %v1550_v49   ;;  %1564 = vperm.xlu1 %2568, %v1547_v27  }
 0x71c   : >> { %v1739_v54 = vpop.permute.xlu0 %1738  ;;  %v1735_v55 = vpop.permute.xlu1 %1734 }
 0x71d   : >> { %v1766_v63 = vsub.f32 %v3125_v35, %v1739_v54  ;;  %v1765_v15 = vsub.f32 %v3121_v20, %v1735_v55 }
 0x71f   : >> { %v3183_v37 = vmul.f32 %v1766_v63, %v2860_v57  ;;  %v1771_v61 = vmul.f32 %v1765_v15, %v2852_v51 }
 0x720   : >> { %v1754_v18 = vpop.permute.xlu0 %1753  ;;  %v1750_v16 = vpop.permute.xlu1 %1749 }
 0x721   : >> { %v1769_v19 = vsub.f32 %v3127_v59, %v1754_v18  ;;  %v1768_v58 = vsub.f32 %v3123_v62, %v1750_v16  ;;  %v1778_v43 = vmul.f32 %v3183_v37, %v3055_v14  ;;  %v1777_v4 = vmul.f32 %v1771_v61, %v3053_v13 }
 0x723   : >> { %v1775_v35 = vmul.f32 %v1769_v19, %v2860_v57  ;;  %v1774_v20 = vmul.f32 %v1768_v58, %v2852_v51  ;;  %1793 = vperm.xlu0 %2569, %v1778_v43   ;;  %1790 = vperm.xlu1 %2568, %v1777_v4  }
 0x724   : >> { %v1758_v17 = vpop.permute.xlu0 %1757  ;;  %v1743_v0 = vpop.permute.xlu1 %1742 }
 0x725   : >> { %v1770_v44 = vsub.f32 %v3131_v40, %v1758_v17  ;;  %v1767_v2 = vsub.f32 %v3129_v26, %v1743_v0  ;;  %v1781_v59 = vmul.f32 %v1775_v35, %v3072_v28  ;;  %v1780_v62 = vmul.f32 %v1774_v20, %v3070_v24 }
 0x727   : >> { %v1776_v14 = vmul.f32 %v1770_v44, %v2870_v3  ;;  %v3199_v13 = vmul.f32 %v1767_v2, %v2870_v3  ;;  %1802 = vperm.xlu0 %2569, %v1781_v59   ;;  %1799 = vperm.xlu1 %2568, %v1780_v62  }
 0x729   : >> { %v1782_v51 = vmul.f32 %v1776_v14, %v3092_v46  ;;  %v1779_v57 = vmul.f32 %v3199_v13, %v3088_v41 }
 0x72b   : >> { %1805 = vperm.xlu0 %2569, %v1782_v51   ;;  %1796 = vperm.xlu1 %2568, %v1779_v57  }
 0x735   : >> { %v615_v40 = vpop.permute.xlu0 %614  ;;  %v612_v26 = vpop.permute.xlu1 %611 }
 0x736   : >> { %v636_v10 = vrot.slane %v615_v40, %v2892_v29  ;;  %v631_v45 = vrot.slane %v612_v26, %v2899_v34 }
 0x738   : >> { %v638_v15 = vsel %vm637_vm4, %v636_v10, %v631_v45 }
 0x739   : >> { %v621_v60 = vpop.permute.xlu0 %620  ;;  %v618_v28 = vpop.permute.xlu1 %617 }
 0x73a   : >> { %v649_v46 = vrot.slane %v621_v60, %v2899_v34  ;;  %v643_v53 = vrot.slane %v618_v28, %v2895_v33 }
 0x73c   : >> { %v645_v17 = vsel %vm644_vm5, %v643_v53, %v638_v15  ;;  %v2124_v53 = vsub.f32 %v3008_v47, %v2912_v56 }
 0x73d   : >> { %v1559_v7 = vpop.permute.xlu0 %1558  ;;  %v624_v24 = vpop.permute.xlu1 %623 }
 0x73e   : >> { %v653_v3 = vrot.slane %v624_v24, %v2892_v29  ;;  %v1578_v18 = vrot.slane %v1559_v7, %v2899_v34 }
 0x740   : >> { %v654_v49 = vsel %vm637_vm4, %v653_v3, %v649_v46 }
 0x741   : >> { %v1568_v1 = vpop.permute.xlu0 %1567  ;;  %v1562_v8 = vpop.permute.xlu1 %1561 }
 0x742   : >> { %v1582_v54 = vrot.slane %v1562_v8, %v2892_v29  ;;  %v1592_v16 = vrot.slane %v1568_v1, %v2899_v34 }
 0x744   : >> { %v1583_v0 = vsel %vm637_vm4, %v1582_v54, %v1578_v18  ;;  %v399_v18 = vld [vmem:[%s3246_s9] sm:$0x1] }
 0x745   : >> { %v627_v52 = vpop.permute.xlu0 %626  ;;  %v1571_v41 = vpop.permute.xlu1 %1570 }
 0x746   : >> { %v658_v27 = vrot.slane %v627_v52, %v2895_v33  ;;  %v1596_v55 = vrot.slane %v1571_v41, %v2892_v29 }
 0x748   : >> { %v659_v63 = vsel %vm644_vm5, %v658_v27, %v654_v49  ;;  %v1597_v44 = vsel %vm637_vm4, %v1596_v55, %v1592_v16  ;;  %v2126_v55 = vrot.slane %v2124_v53, 1  ;;  %v2129_v16 = vadd.f32 %v2124_v53, %v399_v18  ;;  %v2576_v53 = vld [vmem:[%s2700_s24] sm:$0xff] }
 0x749   : >> { %v1574_v19 = vpop.permute.xlu0 %1573  ;;  %v1565_v58 = vpop.permute.xlu1 %1564  ;;  %v661_v2 = vsel %vm660_vm6, %v659_v63, %v645_v17 }
 0x74a   : >> { %v1601_v43 = vrot.slane %v1574_v19, %v2895_v33  ;;  %v1587_v4 = vrot.slane %v1565_v58, %v2895_v33  ;;  %v664_v57 = vsel %vm663_vm2, %v661_v2, 0.0  ;;  %v400_v58 = vld [vmem:[%s3246_s9 + $0x18] sm:$0x1] }
 0x74c   : >> { %v1588_v59 = vsel %vm644_vm5, %v1587_v4, %v1583_v0  ;;  %v1602_v62 = vsel %vm644_vm5, %v1601_v43, %v1597_v44  ;;  %v2130_v43 = vadd.f32 %v2126_v55, %v400_v58 }
 0x74d   : >> { %v1603_v51 = vsel %vm660_vm6, %v1602_v62, %v1588_v59 }
 0x74e   : >> { %v1605_v40 = vsel %vm663_vm2, %v1603_v51, 0.0 }
 0x74f   : >> { %665 = vadd.xlane.f32.xlu1 %v664_v57  ;;  %1606 = vadd.xlane.f32.xlu0 %v1605_v40 }
 0x760   : >> { %1850 = vperm.xlu1 %2568, %v1771_v61  }
 0x764   : >> { %1859 = vperm.xlu1 %2568, %v1774_v20  }
 0x765   : >> { %1853 = vperm.xlu0 %2569, %v3183_v37  }
 0x768   : >> { %1862 = vperm.xlu1 %2568, %v1775_v35  }
 0x76c   : >> { %1865 = vperm.xlu1 %2568, %v1776_v14  }
 0x7a2   : >> { %v1794_v26 = vpop.permute.xlu0 %1793  ;;  %v1791_v60 = vpop.permute.xlu1 %1790 }
 0x7a3   : >> { %v1814_v24 = vrot.slane %v1794_v26, %v2892_v29  ;;  %v1810_v1 = vrot.slane %v1791_v60, %v2899_v34 }
 0x7a5   : >> { %v1815_v14 = vsel %vm637_vm4, %v1814_v24, %v1810_v1 }
 0x7a6   : >> { %v1803_v28 = vpop.permute.xlu0 %1802  ;;  %v1800_v7 = vpop.permute.xlu1 %1799 }
 0x7a7   : >> { %v1828_v8 = vrot.slane %v1803_v28, %v2892_v29  ;;  %v1824_v3 = vrot.slane %v1800_v7, %v2899_v34 }
 0x7a9   : >> { %v1829_v10 = vsel %vm637_vm4, %v1828_v8, %v1824_v3 }
 0x7aa   : >> { %v1806_v61 = vpop.permute.xlu0 %1805  ;;  %v1797_v20 = vpop.permute.xlu1 %1796 }
 0x7ab   : >> { %v1833_v37 = vrot.slane %v1806_v61, %v2895_v33  ;;  %v1819_v35 = vrot.slane %v1797_v20, %v2895_v33 }
 0x7ad   : >> { %v1820_v45 = vsel %vm644_vm5, %v1819_v35, %v1815_v14  ;;  %v1834_v46 = vsel %vm644_vm5, %v1833_v37, %v1829_v10 }
 0x7ae   : >> { %v1835_v52 = vsel %vm660_vm6, %v1834_v46, %v1820_v45 }
 0x7af   : >> { %v1837_v41 = vsel %vm663_vm2, %v1835_v52, 0.0 }
 0x7b0   : >> { %1838 = vadd.xlane.f32.xlu0 %v1837_v41 }
 0x7c6   : >> { %1856 = vperm.xlu0 %2569, %v3199_v13  }
 0x7dc   : >> { %v1607_v27 = vpop.xlane.xlu0 %1606  ;;  %v666_v49 = vpop.xlane.xlu1 %665 }
 0x7dd   : >> { %v1608_v54 = vadd.f32 %v1607_v27, %v666_v49 }
 0x7df   : >> { %v2121_v63 = vmul.f32 %v2784_v36, %v1608_v54  ;;  %v2131_v15 = vsub.f32 %v1608_v54, %v666_v49  ;;  %v2577_v49 = vld [vmem:[%s2700_s24 + $0x8] sm:$0xff] }
 0x7e0   : >> { %v1851_v2 = vpop.permute.xlu1 %1850 }
 0x7e1   : >> { %v2132_v19 = vmul.f32 %v2784_v36, %v2131_v15  ;;  %v2122_v13 = vadd.f32 %v2121_v63, %v3008_v47  ;;  %v1870_v28 = vrot.slane %v1851_v2, %v2899_v34  ;;  %v2578_v15 = vld [vmem:[%s2700_s24 + $0x10] sm:$0x3f] }
 0x7e3   : >> { %v2134_v56 = vrot.slane %v2132_v19, 1  ;;  %v3253_v4 = vadd.f32 %v2132_v19, %v2129_v16  ;;  %v2142_v17 = vrot.slane %v2122_v13, %v3006_v25  ;;  %v2157_v44 = vrot.slane %v2122_v13, %v3013_v50 }
 0x7e4   : >> { %v1860_v59 = vpop.permute.xlu1 %1859  ;;  %v1854_v62 = vpop.permute.xlu0 %1853  ;;  %v2600_v13 = vmov 1966171168  }
 0x7e5   : >> { %v3256_v0 = vadd.f32 %v2134_v56, %v2130_v43  ;;  %2148 = vbcast.lane.b32.xlu1 %v2142_v17, 264  ;;  %2144 = vbcast.lane.b32.xlu0 %v2142_v17, 256  ;;  %v1874_v40 = vrot.slane %v1854_v62, %v2892_v29  ;;  %v1884_v3 = vrot.slane %v1860_v59, %v2899_v34  ;;  %v1998_v58 = vunpack.c.l.s4 %v2600_v13  ;;  %v3413_v13 = vld [vmem:[#allocation14_spill] sm:$0xff] }
 0x7e7   : >> { %v1875_v8 = vsel %vm637_vm4, %v1874_v40, %v1870_v28  ;;  %v1999_v43 = vunpack.c.0.s8 %v1998_v58 }
 0x7e8   : >> { %v1863_v47 = vpop.permute.xlu1 %1862 }
 0x7e9   : >> { %2159 = vbcast.lane.b32.xlu1 %v2157_v44, 256  ;;  %2152 = vbcast.lane.b32.xlu0 %v2142_v17, 272  ;;  %v1888_v7 = vrot.slane %v1863_v47, %v2892_v29 }
 0x7eb   : >> { %v1889_v37 = vsel %vm637_vm4, %v1888_v7, %v1884_v3  ;;  %v1980_v7 = vsub.f32 %v2958_v22, %v3143_v6 }
 0x7ec   : >> { %v1866_v26 = vpop.permute.xlu1 %1865 }
 0x7ed   : >> { %v1893_v1 = vrot.slane %v1866_v26, %v2895_v33 }
 0x7ef   : >> { %v1894_v35 = vsel %vm644_vm5, %v1893_v1, %v1889_v37 }
 0x83d   : >> { %v1839_v51 = vpop.xlane.xlu0 %1838 }
 0x83e   : >> { %v3259_v57 = vsub.f32 %v1608_v54, %v1839_v51 }
 0x840   : >> { %2574 = vrcp.f32 %v3259_v57 }
 0x845   : >> { %v1857_v60 = vpop.permute.xlu0 %1856 }
 0x846   : >> { %v1879_v24 = vrot.slane %v1857_v60, %v2895_v33  ;;  %v1979_v60 = vsub.f32 %v2949_v21, %v3141_v32  ;;  %v1982_v32 = vsub.f32 %v2980_v42, %v3154_v12 }
 0x848   : >> { %v1880_v61 = vsel %vm644_vm5, %v1879_v24, %v1875_v8  ;;  %v1993_v8 = vrot.slane %v3259_v57, %v3013_v50 }
 0x849   : >> { %v1895_v29 = vsel %vm660_vm6, %v1894_v35, %v1880_v61 }
 0x84a   : >> { %v2575_v20 = vpop.eup %2574 }
 0x84b   : >> { %v1842_v14 = vsub.f32 0.0, %v2575_v20  ;;  %v2047_v45 = vmul.f32 %v2575_v20, %v2784_v36 }
 0x84d   : >> { %v1897_v10 = vmul.f32 %v1895_v29, %v1842_v14  ;;  %v1981_v29 = vsub.f32 %v2964_v23, %v3139_v5 }
 0x84f   : >> { %v1901_v33 = vrot.slane %v1897_v10, %v3006_v25  ;;  %v1916_v34 = vrot.slane %v1897_v10, %v3013_v50  ;;  %v3276_v41 = vadd.f32 %v2047_v45, %v1897_v10  ;;  %v1983_v45 = vsub.f32 %v2991_v31, %v3156_v48 }
 0x851   : >> { %1907 = vbcast.lane.b32.xlu1 %v1901_v33, 264  ;;  %1903 = vbcast.lane.b32.xlu0 %v1901_v33, 256  ;;  %v2052_v63 = vrot.slane %v3276_v41, %v3006_v25  ;;  %v2067_v19 = vrot.slane %v3276_v41, %v3013_v50 }
 0x855   : >> { %1918 = vbcast.lane.b32.xlu1 %v1916_v34, 256  ;;  %1911 = vbcast.lane.b32.xlu0 %v1901_v33, 272 }
 0x857   : >> { %v2145_v46 = vpop.permute.xlu0 %2144  ;;  %v2149_v52 = vpop.permute.xlu1 %2148 }
 0x858   : >> { %v2169_v27 = vsel %vm2746_vm3, %v2145_v46, %v2576_v53  ;;  %v2170_v54 = vsel %vm2746_vm3, %v2149_v52, %v2577_v49 }
 0x859   : >> { %2175 = vst.msk [vmem:[%s2700_s24] sm:$0xff] %vm291_vm0, %v2169_v27  ;;  %2176 = vst.msk [vmem:[%s2700_s24 + $0x8] sm:$0xff] %vm291_vm0, %v2170_v54  ;;  %1926 = vbcast.lane.b32.xlu1 %v1916_v34, 272  ;;  %1922 = vbcast.lane.b32.xlu0 %v1916_v34, 264 }
 0x85b   : >> { %v2153_v36 = vpop.permute.xlu0 %2152  ;;  %v2160_v55 = vpop.permute.xlu1 %2159 }
 0x85c   : >> { %v2171_v18 = vsel %vm2746_vm3, %v2153_v36, %v2578_v15  ;;  %v2172_v16 = vsel %vm2746_vm3, %v2160_v55, %v2790_v38  ;;  %v3303_v38 = vsub.s32 %v1999_v43, %v2684_v9  ;;  %v3414_v43 = vld [vmem:[#allocation15_spill] sm:$0xff] }
 0x85d   : >> { %2177 = vst.msk [vmem:[%s2700_s24 + $0x10] sm:$0x3f] %vm294_vm1, %v2171_v18  ;;  %2058 = vbcast.lane.b32.xlu1 %v2052_v63, 264  ;;  %2054 = vbcast.lane.b32.xlu0 %v2052_v63, 256 }
 0x85e   : >> { %2178 = vst.msk [vmem:[%s2700_s24 + $0x18] sm:$0xff] %vm291_vm0, %v2172_v16  ;;  %v2003_v56 = vrot.slane %v1897_v10, %v3303_v38  ;;  %v2099_v5 = vrot.slane %v3276_v41, %v3303_v38 }
 0x860   : >> { %v2011_v17 = vrot.slane %v2003_v56, %v3303_v38  ;;  %v2004_v2 = vcombine.high %v2003_v56, %v2003_v56  ;;  %v2100_v31 = vcombine.high %v2099_v5, %v2099_v5  ;;  %v2107_v55 = vrot.slane %v2099_v5, %v3303_v38 }
 0x861   : >> { %2069 = vbcast.lane.b32.xlu1 %v2067_v19, 256  ;;  %2062 = vbcast.lane.b32.xlu0 %v2052_v63, 272 }
 0x862   : >> { %v2022_v59 = vrot.slane %v2011_v17, %v3006_v25  ;;  %v2018_v62 = vrot.slane %v2004_v2, %v3303_v38  ;;  %v2114_v63 = vrot.slane %v2100_v31, %v3303_v38 }
 0x864   : >> { %v2026_v1 = vrot.slane %v2018_v62, %v3006_v25 }
 0x865   : >> { %2077 = vbcast.lane.b32.xlu1 %v2067_v19, 272  ;;  %2073 = vbcast.lane.b32.xlu0 %v2067_v19, 264 }
 0x869   : >> { %2167 = vbcast.lane.b32.xlu1 %v2157_v44, 272  ;;  %2163 = vbcast.lane.b32.xlu0 %v2157_v44, 264  ;;  %v1989_v44 = vrot.slane %v3259_v57, %v3006_v25  ;;  %v1984_v57 = vsub.f32 %v2999_v39, %v3152_v11 }
 0x8c3   : >> { %v1904_v51 = vpop.permute.xlu0 %1903  ;;  %v1908_v47 = vpop.permute.xlu1 %1907 }
 0x8c4   : >> { %v2029_v40 = vmul.f32 %v2022_v59, %v1904_v51  ;;  %v2030_v26 = vmul.f32 %v2022_v59, %v1908_v47 }
 0x8c6   : >> { %v2035_v28 = vmul.f32 %v2029_v40, %v1989_v44  ;;  %v2036_v24 = vmul.f32 %v2030_v26, %v1989_v44 }
 0x8c7   : >> { %v1912_v3 = vpop.permute.xlu0 %1911  ;;  %v1919_v61 = vpop.permute.xlu1 %1918 }
 0x8c8   : >> { %v2041_v20 = vadd.f32 %v2035_v28, %v1979_v60  ;;  %v2042_v37 = vadd.f32 %v2036_v24, %v1980_v7  ;;  %v2031_v35 = vmul.f32 %v2022_v59, %v1912_v3  ;;  %v2032_v14 = vmul.f32 %v2026_v1, %v1919_v61 }
 0x8ca   : >> { %v2037_v21 = vmul.f32 %v2031_v35, %v1989_v44  ;;  %v2038_v6 = vmul.f32 %v2032_v14, %v1993_v8 }
 0x8cb   : >> { %v1923_v22 = vpop.permute.xlu0 %1922  ;;  %v1927_v10 = vpop.permute.xlu1 %1926 }
 0x8cc   : >> { %v2043_v25 = vadd.f32 %v2037_v21, %v1981_v29  ;;  %v2044_v33 = vadd.f32 %v2038_v6, %v1982_v32  ;;  %v2033_v34 = vmul.f32 %v2026_v1, %v1923_v22  ;;  %v2034_v50 = vmul.f32 %v2026_v1, %v1927_v10 }
 0x8ce   : >> { %v2039_v46 = vmul.f32 %v2033_v34, %v1993_v8  ;;  %v2040_v52 = vmul.f32 %v2034_v50, %v1993_v8 }
 0x8cf   : >> { %v2055_v23 = vpop.permute.xlu0 %2054  ;;  %v2059_v12 = vpop.permute.xlu1 %2058 }
 0x8d0   : >> { %v2045_v42 = vadd.f32 %v2039_v46, %v1983_v45  ;;  %v2046_v53 = vadd.f32 %v2040_v52, %v1984_v57  ;;  %v2080_v27 = vsel %vm2746_vm3, %v2055_v23, %v2041_v20  ;;  %v2081_v49 = vsel %vm2746_vm3, %v2059_v12, %v2042_v37 }
 0x8d1   : >> { %2086 = vst.msk [vmem:[#allocation2] sm:$0xff] %vm291_vm0, %v2080_v27  ;;  %2087 = vst.msk [vmem:[#allocation2 + $0x8] sm:$0xff] %vm291_vm0, %v2081_v49 }
 0x8d3   : >> { %v2063_v11 = vpop.permute.xlu0 %2062  ;;  %v2070_v48 = vpop.permute.xlu1 %2069 }
 0x8d4   : >> { %v2082_v39 = vsel %vm2746_vm3, %v2063_v11, %v2043_v25  ;;  %v2083_v41 = vsel %vm2746_vm3, %v2070_v48, %v2044_v33 }
 0x8d5   : >> { %2088 = vst.msk [vmem:[#allocation2 + $0x10] sm:$0x3f] %vm294_vm1, %v2082_v39 }
 0x8d6   : >> { %2089 = vst.msk [vmem:[#allocation2 + $0x18] sm:$0xff] %vm291_vm0, %v2083_v41 }
 0x8d7   : >> { %v2074_v54 = vpop.permute.xlu0 %2073  ;;  %v2078_v36 = vpop.permute.xlu1 %2077 }
 0x8d8   : >> { %v2084_v15 = vsel %vm2746_vm3, %v2074_v54, %v2045_v42  ;;  %v2085_v18 = vsel %vm2746_vm3, %v2078_v36, %v2046_v53 }
 0x8d9   : >> { %2090 = vst.msk [vmem:[#allocation2 + $0x20] sm:$0xff] %vm291_vm0, %v2084_v15  ;;  %329 = sbr.rel (!%p327_p6) target bundleno = 29 (0x1d), region = 86 }
 0x8da   : >> { %2091 = vst.msk [vmem:[#allocation2 + $0x28] sm:$0x3f] %vm294_vm1, %v2085_v18 }
 0x8db   : >> { %2119 = vst.msk [vmem:[%s2117_s10] sm:$0x1] %vm2118_vm8, %v2107_v55  ;;  %2120 = vst.msk [vmem:[%s2117_s10 + $0x18] sm:$0x1] %vm2118_vm8, %v2114_v63  ;;  %v2164_v16 = vpop.permute.xlu0 %2163  ;;  %v2168_v19 = vpop.permute.xlu1 %2167 }
 0x8dc   : >> { %v2173_v58 = vsel %vm2746_vm3, %v2164_v16, %v3413_v13  ;;  %v2174_v38 = vsel %vm2746_vm3, %v2168_v19, %v3414_v43 }
 0x8dd   : >> { %2179 = vst.msk [vmem:[%s2700_s24 + $0x20] sm:$0xff] %vm291_vm0, %v2173_v58 }
 0x8de   : >> { %2180 = vst.msk [vmem:[%s2700_s24 + $0x28] sm:$0x3f] %vm294_vm1, %v2174_v38 }
 0x8df   : >> { %2181 = vst.msk [vmem:[%s3246_s9] sm:$0x1] %vm2118_vm8, %v3253_v4  ;;  %2182 = vst.msk [vmem:[%s3246_s9 + $0x18] sm:$0x1] %vm2118_vm8, %v3256_v0 }
 0x8e0 PF: > { %s16_s21 = sadd.s32 1, %s2589_s21  }
 0x8e1   : > { %p13_p7 = scmp.ge.s32.totalorder %s16_s21, 4  }
 0x8e3   :  { %15 = sbr.rel (!%p13_p7) target bundleno = 1 (0x1), region = 97 }

</bundles_post_ra>
